<compile_context>
chip_gen: v6e
topology: v6e:2x2x1
jax: 0.10.0
libtpu: 0.0.40
codegen_flags: <defaults>
</compile_context>

<pallas_src>
import jax
import jax.numpy as jnp
import numpy as np
from jax import lax
from jax.experimental import pallas as pl
from jax.experimental.pallas import tpu as pltpu

_NEG_PAD = -1e30  # padded-logit bias: exp underflows to exactly 0 -> LSE unchanged


def _make_lstm_kernel(T: int, L: int, Bp: int, H: int):
    G = 4 * H

    def kernel(xg_ref, h0_ref, c0_ref,
               whh0_ref, wihR_ref, whhR_ref, bR_ref,
               wout_ref, bout_ref,
               logp_ref, hT_ref, cT_ref):
        # ---- hoisted constants / weight loads (outside the time loop) ----
        lane = lax.broadcasted_iota(jnp.int32, (Bp, G), dimension=1)
        is_tanh = (lane >= 2 * H) & (lane < 3 * H)        # gate order i,f,g,o
        whh0 = whh0_ref[...]                              # (H, 4H)
        wout = wout_ref[...]                              # (H, Vp)
        bout = bout_ref[...]                              # (1, Vp)
        if L > 1:
            wihR = wihR_ref[...]                          # (L-1, H, 4H)
            whhR = whhR_ref[...]                          # (L-1, H, 4H)
            bR = bR_ref[...]                              # (L-1, 1, 4H)

        def cell(gates, c_prev):
            # one full-vreg (128-lane) nonlinearity pass (EUP), slice only for
            # the elementwise cell update.
            act = jnp.where(is_tanh, jnp.tanh(gates), jax.nn.sigmoid(gates))
            i_g = act[:, 0 * H:1 * H]
            f_g = act[:, 1 * H:2 * H]
            g_g = act[:, 2 * H:3 * H]
            o_g = act[:, 3 * H:4 * H]
            c_new = f_g * c_prev + i_g * g_g
            h_new = o_g * jnp.tanh(c_new)
            return h_new, c_new

        def step(t, carry):
            hs, cs = carry
            h_new = [None] * L
            c_new = [None] * L
            # layer 0: x-projection (+bias) was precomputed for all timesteps;
            # only one MXU matmul (hidden projection) per step here.
            gates = xg_ref[t] + jnp.dot(hs[0], whh0,
                                        preferred_element_type=jnp.float32)
            h_new[0], c_new[0] = cell(gates, cs[0])
            inp = h_new[0]
            for l in range(1, L):
                gates = (jnp.dot(inp, wihR[l - 1],
                                 preferred_element_type=jnp.float32)
                         + jnp.dot(hs[l], whhR[l - 1],
                                   preferred_element_type=jnp.float32)
                         + bR[l - 1])
                h_new[l], c_new[l] = cell(gates, cs[l])
                inp = h_new[l]
            # TODO(synk): inter-layer dropout omitted (dropout=0.0 / eval -> identity).

            # hidden2tag + LogSoftmax, lane-dense (Vp = 128) output store.
            logits = jnp.dot(inp, wout,
                             preferred_element_type=jnp.float32) + bout
            m = jnp.max(logits, axis=-1, keepdims=True)
            lse = jnp.log(jnp.sum(jnp.exp(logits - m), axis=-1,
                                  keepdims=True)) + m
            logp_ref[t] = logits - lse
            return tuple(h_new), tuple(c_new)

        h_init = tuple(h0_ref[l] for l in range(L))
        c_init = tuple(c0_ref[l] for l in range(L))
        hs, cs = lax.fori_loop(0, T, step, (h_init, c_init), unroll=True)

        # final states written exactly once
        for l in range(L):
            hT_ref[l] = hs[l]
            cT_ref[l] = cs[l]

    return kernel


def lstm_token_logprobs(x_emb, h0, c0,
                        w_ih0, w_hh0, b_ih0, b_hh0,
                        w_ihR, w_hhR, b_ihR, b_hhR,
                        w_out, b_out):
    """Multi-layer LSTM + hidden2tag + log-softmax via a single Pallas kernel.

    x_emb : (T, B, E) float32, time-major embedded inputs
    h0,c0 : (L, 1, H) learned initial states (broadcast over batch here)
    returns (log_probs (T,B,V_out), h_T (L,B,H), c_T (L,B,H))
    """
    T, B, E = x_emb.shape
    L = h0.shape[0]
    H = w_hh0.shape[1]
    V_out = w_out.shape[0]
    G = 4 * H
    Bp = ((B + 7) // 8) * 8                  # fill full sublanes
    Vp = ((V_out + 127) // 128) * 128        # lane-dense output store

    f32 = jnp.float32
    x = x_emb.astype(f32)
    if Bp != B:
        x = jnp.pad(x, ((0, 0), (0, Bp - B), (0, 0)))

    # Layer-0 input projection (+ combined i/h bias) for ALL timesteps in one
    # parallel matmul, outside the sequential recurrence.
    b0 = (b_ih0 + b_hh0).astype(f32)
    xg = jnp.einsum('tbe,eg->tbg', x, w_ih0.T.astype(f32),
                    precision=jax.lax.Precision.HIGHEST) + b0[None, None, :]

    h0b = jnp.broadcast_to(h0, (L, Bp, H)).astype(f32)
    c0b = jnp.broadcast_to(c0, (L, Bp, H)).astype(f32)
    whh0_T = w_hh0.T.astype(f32)                         # (H, 4H)
    if L > 1:
        wihR_T = jnp.transpose(w_ihR, (0, 2, 1)).astype(f32)   # (L-1, H, 4H)
        whhR_T = jnp.transpose(w_hhR, (0, 2, 1)).astype(f32)   # (L-1, H, 4H)
        bR = (b_ihR + b_hhR)[:, None, :].astype(f32)           # (L-1, 1, 4H)
    else:  # placeholders so the arg list is static; never read when L == 1
        wihR_T = jnp.zeros((1, H, G), f32)
        whhR_T = jnp.zeros((1, H, G), f32)
        bR = jnp.zeros((1, 1, G), f32)
    LR = max(L - 1, 1)

    # Pad hidden2tag to 128 lanes: zero weight columns + -1e30 bias padding
    # keeps the log-softmax over the real V_out classes exact.
    wout_pad = jnp.pad(w_out.T.astype(f32), ((0, 0), (0, Vp - V_out)))
    bout_pad = jnp.pad(b_out.astype(f32), (0, Vp - V_out),
                       constant_values=_NEG_PAD)[None, :]

    def full_spec(shape):
        nd = len(shape)
        return pl.BlockSpec(shape, lambda t, _nd=nd: (0,) * _nd)

    in_specs = [
        full_spec((T, Bp, G)),      # precomputed layer-0 gates input (lane-dense)
        full_spec((L, Bp, H)),      # h0
        full_spec((L, Bp, H)),      # c0
        full_spec((H, G)),          # w_hh layer 0 (transposed)
        full_spec((LR, H, G)),      # w_ih layers 1..L-1 (transposed)
        full_spec((LR, H, G)),      # w_hh layers 1..L-1 (transposed)
        full_spec((LR, 1, G)),      # combined bias layers 1..L-1
        full_spec((H, Vp)),         # hidden2tag weight (transposed, padded)
        full_spec((1, Vp)),         # hidden2tag bias (padded with -1e30)
    ]
    out_specs = [
        full_spec((T, Bp, Vp)),     # log-probs (lane-dense, padded)
        full_spec((L, Bp, H)),      # final h
        full_spec((L, Bp, H)),      # final c
    ]
    out_shape = (
        jax.ShapeDtypeStruct((T, Bp, Vp), f32),
        jax.ShapeDtypeStruct((L, Bp, H), f32),
        jax.ShapeDtypeStruct((L, Bp, H), f32),
    )

    grid_spec = pltpu.PrefetchScalarGridSpec(
        num_scalar_prefetch=0,
        grid=(1,),                  # entire recurrence in one kernel invocation
        in_specs=in_specs,
        out_specs=out_specs,
    )

    logp_pad, hT, cT = pl.pallas_call(
        _make_lstm_kernel(T, L, Bp, H),
        out_shape=out_shape,
        grid_spec=grid_spec,
        compiler_params=pltpu.CompilerParams(
            dimension_semantics=("arbitrary",)),
    )(xg, h0b, c0b, whh0_T, wihR_T, whhR_T, bR, wout_pad, bout_pad)

    # strip batch / vocab padding
    return logp_pad[:, :B, :V_out], hT[:, :B], cT[:, :B]


def _ref_forward(x_emb, h0, c0, w_ih_list, w_hh_list, b_ih_list, b_hh_list,
                 w_out, b_out):
    """Pure-JAX reference (PyTorch nn.LSTM semantics) for correctness check."""
    T, B, _ = x_emb.shape
    L = len(w_ih_list)
    H = w_hh_list[0].shape[1]
    h = [jnp.broadcast_to(h0[l], (B, H)) for l in range(L)]
    c = [jnp.broadcast_to(c0[l], (B, H)) for l in range(L)]
    outs = []
    for t in range(T):
        inp = x_emb[t]
        for l in range(L):
            g = inp @ w_ih_list[l].T + h[l] @ w_hh_list[l].T \
                + b_ih_list[l] + b_hh_list[l]
            i = jax.nn.sigmoid(g[:, :H])
            f = jax.nn.sigmoid(g[:, H:2 * H])
            gg = jnp.tanh(g[:, 2 * H:3 * H])
            o = jax.nn.sigmoid(g[:, 3 * H:4 * H])
            c[l] = f * c[l] + i * gg
            h[l] = o * jnp.tanh(c[l])
            inp = h[l]
        logits = inp @ w_out.T + b_out
        outs.append(jax.nn.log_softmax(logits, axis=-1))
    return jnp.stack(outs), jnp.stack(h), jnp.stack(c)


if __name__ == "__main__":
    # Hyperparameters consistent with RNNModule.__init__ (RNNClass='LSTM').
    input_dim = 16
    hidden_dim = 32
    num_layers = 2
    num_output_tokens = 12
    num_input_tokens = 20
    T, B = 8, 2          # seq length, batch of equal-length sorted sequences

    key = jax.random.PRNGKey(0)
    ks = jax.random.split(key, 16)
    bound = 1.0 / np.sqrt(hidden_dim)

    def uni(k, shape):
        return jax.random.uniform(k, shape, jnp.float32, -bound, bound)

    # nn.Embedding: N(0,1) init
    embedding = jax.random.normal(ks[0], (num_input_tokens, input_dim), jnp.float32)
    # nn.LSTM weights (gate order i,f,g,o packed along dim 0)
    w_ih0 = uni(ks[1], (4 * hidden_dim, input_dim))
    w_hh0 = uni(ks[2], (4 * hidden_dim, hidden_dim))
    b_ih0 = uni(ks[3], (4 * hidden_dim,))
    b_hh0 = uni(ks[4], (4 * hidden_dim,))
    w_ihR = uni(ks[5], (num_layers - 1, 4 * hidden_dim, hidden_dim))
    w_hhR = uni(ks[6], (num_layers - 1, 4 * hidden_dim, hidden_dim))
    b_ihR = uni(ks[7], (num_layers - 1, 4 * hidden_dim))
    b_hhR = uni(ks[8], (num_layers - 1, 4 * hidden_dim))
    # hidden2tag Linear
    w_out = uni(ks[9], (num_output_tokens, hidden_dim))
    b_out = uni(ks[10], (num_output_tokens,))
    # learned initial states: nn.Parameter(torch.zeros(num_layers, 1, hidden))
    initial_h = jnp.zeros((num_layers, 1, hidden_dim), jnp.float32)
    initial_c = jnp.zeros((num_layers, 1, hidden_dim), jnp.float32)

    # Input: batch of token-index sequences, time-major (T, B).
    tokens = jax.random.randint(ks[11], (T, B), 0, num_input_tokens, jnp.int32)
    x_emb = embedding[tokens]                      # (T, B, E) embedding lookup (glue)

    log_probs, h_T, c_T = lstm_token_logprobs(
        x_emb, initial_h, initial_c,
        w_ih0, w_hh0, b_ih0, b_hh0,
        w_ihR, w_hhR, b_ihR, b_hhR,
        w_out, b_out)
    jax.block_until_ready((log_probs, h_T, c_T))

    # Correctness check against a pure-JAX reference.
    w_ih_list = [w_ih0] + [w_ihR[i] for i in range(num_layers - 1)]
    w_hh_list = [w_hh0] + [w_hhR[i] for i in range(num_layers - 1)]
    b_ih_list = [b_ih0] + [b_ihR[i] for i in range(num_layers - 1)]
    b_hh_list = [b_hh0] + [b_hhR[i] for i in range(num_layers - 1)]
    ref_lp, ref_h, ref_c = _ref_forward(x_emb, initial_h, initial_c,
                                        w_ih_list, w_hh_list,
                                        b_ih_list, b_hh_list, w_out, b_out)
    np.testing.assert_allclose(np.asarray(log_probs), np.asarray(ref_lp),
                               rtol=1e-5, atol=1e-5)
    np.testing.assert_allclose(np.asarray(h_T), np.asarray(ref_h),
                               rtol=1e-5, atol=1e-5)
    np.testing.assert_allclose(np.asarray(c_T), np.asarray(ref_c),
                               rtol=1e-5, atol=1e-5)
    print("KERNEL_OK")
</pallas_src>

<mosaic_0001>
module attributes {stable_mosaic.version = 11 : i64} {
  func.func @kernel(%arg0: i32, %arg1: memref<8x8x128xf32, #tpu.memory_space<vmem>>, %arg2: memref<2x8x32xf32, #tpu.memory_space<vmem>>, %arg3: memref<2x8x32xf32, #tpu.memory_space<vmem>>, %arg4: memref<32x128xf32, #tpu.memory_space<vmem>>, %arg5: memref<1x32x128xf32, #tpu.memory_space<vmem>>, %arg6: memref<1x32x128xf32, #tpu.memory_space<vmem>>, %arg7: memref<1x1x128xf32, #tpu.memory_space<vmem>>, %arg8: memref<32x128xf32, #tpu.memory_space<vmem>>, %arg9: memref<1x128xf32, #tpu.memory_space<vmem>>, %arg10: memref<8x8x128xf32, #tpu.memory_space<vmem>>, %arg11: memref<2x8x32xf32, #tpu.memory_space<vmem>>, %arg12: memref<2x8x32xf32, #tpu.memory_space<vmem>>) attributes {dimension_semantics = [#tpu.dimension_semantics<arbitrary>], iteration_bounds = array<i64: 1>, scalar_prefetch = 0 : i64, scratch_operands = 0 : i64, tpu.core_type = #tpu.core_type<tc>, window_params = [{pipeline_mode = #tpu.pipeline_mode<synchronous>, transform_indices = @transform_0, window_bounds = array<i64: 8, 8, 128>}, {pipeline_mode = #tpu.pipeline_mode<synchronous>, transform_indices = @transform_1, window_bounds = array<i64: 2, 8, 32>}, {pipeline_mode = #tpu.pipeline_mode<synchronous>, transform_indices = @transform_2, window_bounds = array<i64: 2, 8, 32>}, {pipeline_mode = #tpu.pipeline_mode<synchronous>, transform_indices = @transform_3, window_bounds = array<i64: 32, 128>}, {pipeline_mode = #tpu.pipeline_mode<synchronous>, transform_indices = @transform_4, window_bounds = array<i64: 1, 32, 128>}, {pipeline_mode = #tpu.pipeline_mode<synchronous>, transform_indices = @transform_5, window_bounds = array<i64: 1, 32, 128>}, {pipeline_mode = #tpu.pipeline_mode<synchronous>, transform_indices = @transform_6, window_bounds = array<i64: 1, 1, 128>}, {pipeline_mode = #tpu.pipeline_mode<synchronous>, transform_indices = @transform_7, window_bounds = array<i64: 32, 128>}, {pipeline_mode = #tpu.pipeline_mode<synchronous>, transform_indices = @transform_8, window_bounds = array<i64: 1, 128>}, {pipeline_mode = #tpu.pipeline_mode<synchronous>, transform_indices = @transform_9, window_bounds = array<i64: 8, 8, 128>}, {pipeline_mode = #tpu.pipeline_mode<synchronous>, transform_indices = @transform_10, window_bounds = array<i64: 2, 8, 32>}, {pipeline_mode = #tpu.pipeline_mode<synchronous>, transform_indices = @transform_11, window_bounds = array<i64: 2, 8, 32>}]} {
    %0 = tpu.iota {dimensions = array<i32: 1>} : vector<8x128xi32>
    %c64_i32 = arith.constant 64 : i32
    %1 = vector.broadcast %c64_i32 : i32 to vector<8x128xi32>
    %2 = arith.cmpi sge, %0, %1 : vector<8x128xi32>
    %c96_i32 = arith.constant 96 : i32
    %3 = vector.broadcast %c96_i32 : i32 to vector<8x128xi32>
    %4 = arith.cmpi slt, %0, %3 : vector<8x128xi32>
    %5 = arith.andi %2, %4 : vector<8x128xi1>
    %c0 = arith.constant 0 : index
    %c0_0 = arith.constant 0 : index
    %6 = vector.load %arg4[%c0, %c0_0] : memref<32x128xf32, #tpu.memory_space<vmem>>, vector<32x128xf32>
    %c0_1 = arith.constant 0 : index
    %c0_2 = arith.constant 0 : index
    %7 = vector.load %arg8[%c0_1, %c0_2] : memref<32x128xf32, #tpu.memory_space<vmem>>, vector<32x128xf32>
    %c0_3 = arith.constant 0 : index
    %c0_4 = arith.constant 0 : index
    %8 = vector.load %arg9[%c0_3, %c0_4] : memref<1x128xf32, #tpu.memory_space<vmem>>, vector<1x128xf32>
    %c0_5 = arith.constant 0 : index
    %c0_6 = arith.constant 0 : index
    %c0_7 = arith.constant 0 : index
    %9 = vector.load %arg5[%c0_5, %c0_6, %c0_7] : memref<1x32x128xf32, #tpu.memory_space<vmem>>, vector<1x32x128xf32>
    %c0_8 = arith.constant 0 : index
    %c0_9 = arith.constant 0 : index
    %c0_10 = arith.constant 0 : index
    %10 = vector.load %arg6[%c0_8, %c0_9, %c0_10] : memref<1x32x128xf32, #tpu.memory_space<vmem>>, vector<1x32x128xf32>
    %c0_11 = arith.constant 0 : index
    %c0_12 = arith.constant 0 : index
    %c0_13 = arith.constant 0 : index
    %11 = vector.load %arg7[%c0_11, %c0_12, %c0_13] : memref<1x1x128xf32, #tpu.memory_space<vmem>>, vector<1x1x128xf32>
    %c0_14 = arith.constant 0 : index
    %c0_15 = arith.constant 0 : index
    %c0_16 = arith.constant 0 : index
    %12 = vector.load %arg2[%c0_14, %c0_15, %c0_16] : memref<2x8x32xf32, #tpu.memory_space<vmem>>, vector<1x8x32xf32>
    %13 = vector.shape_cast %12 : vector<1x8x32xf32> to vector<8x32xf32>
    %c1 = arith.constant 1 : index
    %c0_17 = arith.constant 0 : index
    %c0_18 = arith.constant 0 : index
    %14 = vector.load %arg2[%c1, %c0_17, %c0_18] : memref<2x8x32xf32, #tpu.memory_space<vmem>>, vector<1x8x32xf32>
    %15 = vector.shape_cast %14 : vector<1x8x32xf32> to vector<8x32xf32>
    %c0_19 = arith.constant 0 : index
    %c0_20 = arith.constant 0 : index
    %c0_21 = arith.constant 0 : index
    %16 = vector.load %arg3[%c0_19, %c0_20, %c0_21] : memref<2x8x32xf32, #tpu.memory_space<vmem>>, vector<1x8x32xf32>
    %17 = vector.shape_cast %16 : vector<1x8x32xf32> to vector<8x32xf32>
    %c1_22 = arith.constant 1 : index
    %c0_23 = arith.constant 0 : index
    %c0_24 = arith.constant 0 : index
    %18 = vector.load %arg3[%c1_22, %c0_23, %c0_24] : memref<2x8x32xf32, #tpu.memory_space<vmem>>, vector<1x8x32xf32>
    %19 = vector.shape_cast %18 : vector<1x8x32xf32> to vector<8x32xf32>
    %c0_i32 = arith.constant 0 : i32
    %20 = arith.index_cast %c0_i32 : i32 to index
    %c0_25 = arith.constant 0 : index
    %c0_26 = arith.constant 0 : index
    %21 = vector.load %arg1[%20, %c0_25, %c0_26] : memref<8x8x128xf32, #tpu.memory_space<vmem>>, vector<1x8x128xf32>
    %22 = vector.shape_cast %21 : vector<1x8x128xf32> to vector<8x128xf32>
    %cst = arith.constant dense<0.000000e+00> : vector<8x128xf32>
    %23 = tpu.matmul %13, %6, %cst {dimension_numbers = #tpu.dot_dimension_numbers<[1], [0], [0], [1], [0, 0, 1, 1], [], []>} : vector<8x32xf32>, vector<32x128xf32>, vector<8x128xf32> -> vector<8x128xf32>
    %24 = arith.addf %22, %23 : vector<8x128xf32>
    %25 = math.tanh %24 : vector<8x128xf32>
    %26 = arith.negf %24 : vector<8x128xf32>
    %27 = math.exp %26 : vector<8x128xf32>
    %cst_27 = arith.constant 1.000000e+00 : f32
    %28 = vector.broadcast %cst_27 : f32 to vector<8x128xf32>
    %29 = arith.addf %28, %27 : vector<8x128xf32>
    %30 = arith.divf %28, %29 : vector<8x128xf32>
    %31 = arith.select %5, %25, %30 : vector<8x128xi1>, vector<8x128xf32>
    %32 = vector.extract_strided_slice %31 {offsets = [0, 0], sizes = [8, 32], strides = [1, 1]} : vector<8x128xf32> to vector<8x32xf32>
    %33 = vector.extract_strided_slice %31 {offsets = [0, 32], sizes = [8, 32], strides = [1, 1]} : vector<8x128xf32> to vector<8x32xf32>
    %34 = vector.extract_strided_slice %31 {offsets = [0, 64], sizes = [8, 32], strides = [1, 1]} : vector<8x128xf32> to vector<8x32xf32>
    %35 = vector.extract_strided_slice %31 {offsets = [0, 96], sizes = [8, 32], strides = [1, 1]} : vector<8x128xf32> to vector<8x32xf32>
    %36 = arith.mulf %33, %17 : vector<8x32xf32>
    %37 = arith.mulf %32, %34 : vector<8x32xf32>
    %38 = arith.addf %36, %37 : vector<8x32xf32>
    %39 = math.tanh %38 : vector<8x32xf32>
    %40 = arith.mulf %35, %39 : vector<8x32xf32>
    %41 = vector.shape_cast %9 : vector<1x32x128xf32> to vector<32x128xf32>
    %cst_28 = arith.constant dense<0.000000e+00> : vector<8x128xf32>
    %42 = tpu.matmul %40, %41, %cst_28 {dimension_numbers = #tpu.dot_dimension_numbers<[1], [0], [0], [1], [0, 0, 1, 1], [], []>} : vector<8x32xf32>, vector<32x128xf32>, vector<8x128xf32> -> vector<8x128xf32>
    %43 = vector.shape_cast %10 : vector<1x32x128xf32> to vector<32x128xf32>
    %cst_29 = arith.constant dense<0.000000e+00> : vector<8x128xf32>
    %44 = tpu.matmul %15, %43, %cst_29 {dimension_numbers = #tpu.dot_dimension_numbers<[1], [0], [0], [1], [0, 0, 1, 1], [], []>} : vector<8x32xf32>, vector<32x128xf32>, vector<8x128xf32> -> vector<8x128xf32>
    %45 = arith.addf %42, %44 : vector<8x128xf32>
    %46 = vector.shape_cast %11 : vector<1x1x128xf32> to vector<1x128xf32>
    %47 = vector.broadcast %46 : vector<1x128xf32> to vector<8x128xf32>
    %48 = arith.addf %45, %47 : vector<8x128xf32>
    %49 = math.tanh %48 : vector<8x128xf32>
    %50 = arith.negf %48 : vector<8x128xf32>
    %51 = math.exp %50 : vector<8x128xf32>
    %cst_30 = arith.constant 1.000000e+00 : f32
    %52 = vector.broadcast %cst_30 : f32 to vector<8x128xf32>
    %53 = arith.addf %52, %51 : vector<8x128xf32>
    %54 = arith.divf %52, %53 : vector<8x128xf32>
    %55 = arith.select %5, %49, %54 : vector<8x128xi1>, vector<8x128xf32>
    %56 = vector.extract_strided_slice %55 {offsets = [0, 0], sizes = [8, 32], strides = [1, 1]} : vector<8x128xf32> to vector<8x32xf32>
    %57 = vector.extract_strided_slice %55 {offsets = [0, 32], sizes = [8, 32], strides = [1, 1]} : vector<8x128xf32> to vector<8x32xf32>
    %58 = vector.extract_strided_slice %55 {offsets = [0, 64], sizes = [8, 32], strides = [1, 1]} : vector<8x128xf32> to vector<8x32xf32>
    %59 = vector.extract_strided_slice %55 {offsets = [0, 96], sizes = [8, 32], strides = [1, 1]} : vector<8x128xf32> to vector<8x32xf32>
    %60 = arith.mulf %57, %19 : vector<8x32xf32>
    %61 = arith.mulf %56, %58 : vector<8x32xf32>
    %62 = arith.addf %60, %61 : vector<8x32xf32>
    %63 = math.tanh %62 : vector<8x32xf32>
    %64 = arith.mulf %59, %63 : vector<8x32xf32>
    %cst_31 = arith.constant dense<0.000000e+00> : vector<8x128xf32>
    %65 = tpu.matmul %64, %7, %cst_31 {dimension_numbers = #tpu.dot_dimension_numbers<[1], [0], [0], [1], [0, 0, 1, 1], [], []>} : vector<8x32xf32>, vector<32x128xf32>, vector<8x128xf32> -> vector<8x128xf32>
    %66 = vector.broadcast %8 : vector<1x128xf32> to vector<8x128xf32>
    %67 = arith.addf %65, %66 : vector<8x128xf32>
    %cst_32 = arith.constant dense<0xFF800000> : vector<8xf32>
    %68 = vector.multi_reduction <maximumf>, %67, %cst_32 [1] : vector<8x128xf32> to vector<8xf32>
    %69 = vector.shape_cast %68 : vector<8xf32> to vector<8x1xf32>
    %70 = vector.broadcast %69 : vector<8x1xf32> to vector<8x128xf32>
    %71 = arith.subf %67, %70 : vector<8x128xf32>
    %72 = math.exp %71 : vector<8x128xf32>
    %cst_33 = arith.constant dense<0.000000e+00> : vector<8xf32>
    %73 = vector.multi_reduction <add>, %72, %cst_33 [1] : vector<8x128xf32> to vector<8xf32>
    %74 = vector.shape_cast %73 : vector<8xf32> to vector<8x1xf32>
    %75 = math.log %74 : vector<8x1xf32>
    %76 = arith.addf %75, %69 : vector<8x1xf32>
    %77 = vector.broadcast %76 : vector<8x1xf32> to vector<8x128xf32>
    %78 = arith.subf %67, %77 : vector<8x128xf32>
    %79 = arith.index_cast %c0_i32 : i32 to index
    %c0_34 = arith.constant 0 : index
    %c0_35 = arith.constant 0 : index
    %80 = vector.load %arg10[%79, %c0_34, %c0_35] : memref<8x8x128xf32, #tpu.memory_space<vmem>>, vector<1x8x128xf32>
    %81 = vector.shape_cast %80 : vector<1x8x128xf32> to vector<8x128xf32>
    %82 = vector.shape_cast %78 : vector<8x128xf32> to vector<1x8x128xf32>
    tpu.vector_store %arg10[%79, %c0_34, %c0_35], %82 {strides = array<i32>} : memref<8x8x128xf32, #tpu.memory_space<vmem>>, vector<1x8x128xf32>,
    %c1_i32 = arith.constant 1 : i32
    %83 = arith.index_cast %c1_i32 : i32 to index
    %c0_36 = arith.constant 0 : index
    %c0_37 = arith.constant 0 : index
    %84 = vector.load %arg1[%83, %c0_36, %c0_37] : memref<8x8x128xf32, #tpu.memory_space<vmem>>, vector<1x8x128xf32>
    %85 = vector.shape_cast %84 : vector<1x8x128xf32> to vector<8x128xf32>
    %cst_38 = arith.constant dense<0.000000e+00> : vector<8x128xf32>
    %86 = tpu.matmul %40, %6, %cst_38 {dimension_numbers = #tpu.dot_dimension_numbers<[1], [0], [0], [1], [0, 0, 1, 1], [], []>} : vector<8x32xf32>, vector<32x128xf32>, vector<8x128xf32> -> vector<8x128xf32>
    %87 = arith.addf %85, %86 : vector<8x128xf32>
    %88 = math.tanh %87 : vector<8x128xf32>
    %89 = arith.negf %87 : vector<8x128xf32>
    %90 = math.exp %89 : vector<8x128xf32>
    %cst_39 = arith.constant 1.000000e+00 : f32
    %91 = vector.broadcast %cst_39 : f32 to vector<8x128xf32>
    %92 = arith.addf %91, %90 : vector<8x128xf32>
    %93 = arith.divf %91, %92 : vector<8x128xf32>
    %94 = arith.select %5, %88, %93 : vector<8x128xi1>, vector<8x128xf32>
    %95 = vector.extract_strided_slice %94 {offsets = [0, 0], sizes = [8, 32], strides = [1, 1]} : vector<8x128xf32> to vector<8x32xf32>
    %96 = vector.extract_strided_slice %94 {offsets = [0, 32], sizes = [8, 32], strides = [1, 1]} : vector<8x128xf32> to vector<8x32xf32>
    %97 = vector.extract_strided_slice %94 {offsets = [0, 64], sizes = [8, 32], strides = [1, 1]} : vector<8x128xf32> to vector<8x32xf32>
    %98 = vector.extract_strided_slice %94 {offsets = [0, 96], sizes = [8, 32], strides = [1, 1]} : vector<8x128xf32> to vector<8x32xf32>
    %99 = arith.mulf %96, %38 : vector<8x32xf32>
    %100 = arith.mulf %95, %97 : vector<8x32xf32>
    %101 = arith.addf %99, %100 : vector<8x32xf32>
    %102 = math.tanh %101 : vector<8x32xf32>
    %103 = arith.mulf %98, %102 : vector<8x32xf32>
    %104 = vector.shape_cast %9 : vector<1x32x128xf32> to vector<32x128xf32>
    %cst_40 = arith.constant dense<0.000000e+00> : vector<8x128xf32>
    %105 = tpu.matmul %103, %104, %cst_40 {dimension_numbers = #tpu.dot_dimension_numbers<[1], [0], [0], [1], [0, 0, 1, 1], [], []>} : vector<8x32xf32>, vector<32x128xf32>, vector<8x128xf32> -> vector<8x128xf32>
    %106 = vector.shape_cast %10 : vector<1x32x128xf32> to vector<32x128xf32>
    %cst_41 = arith.constant dense<0.000000e+00> : vector<8x128xf32>
    %107 = tpu.matmul %64, %106, %cst_41 {dimension_numbers = #tpu.dot_dimension_numbers<[1], [0], [0], [1], [0, 0, 1, 1], [], []>} : vector<8x32xf32>, vector<32x128xf32>, vector<8x128xf32> -> vector<8x128xf32>
    %108 = arith.addf %105, %107 : vector<8x128xf32>
    %109 = vector.shape_cast %11 : vector<1x1x128xf32> to vector<1x128xf32>
    %110 = vector.broadcast %109 : vector<1x128xf32> to vector<8x128xf32>
    %111 = arith.addf %108, %110 : vector<8x128xf32>
    %112 = math.tanh %111 : vector<8x128xf32>
    %113 = arith.negf %111 : vector<8x128xf32>
    %114 = math.exp %113 : vector<8x128xf32>
    %cst_42 = arith.constant 1.000000e+00 : f32
    %115 = vector.broadcast %cst_42 : f32 to vector<8x128xf32>
    %116 = arith.addf %115, %114 : vector<8x128xf32>
    %117 = arith.divf %115, %116 : vector<8x128xf32>
    %118 = arith.select %5, %112, %117 : vector<8x128xi1>, vector<8x128xf32>
    %119 = vector.extract_strided_slice %118 {offsets = [0, 0], sizes = [8, 32], strides = [1, 1]} : vector<8x128xf32> to vector<8x32xf32>
    %120 = vector.extract_strided_slice %118 {offsets = [0, 32], sizes = [8, 32], strides = [1, 1]} : vector<8x128xf32> to vector<8x32xf32>
    %121 = vector.extract_strided_slice %118 {offsets = [0, 64], sizes = [8, 32], strides = [1, 1]} : vector<8x128xf32> to vector<8x32xf32>
    %122 = vector.extract_strided_slice %118 {offsets = [0, 96], sizes = [8, 32], strides = [1, 1]} : vector<8x128xf32> to vector<8x32xf32>
    %123 = arith.mulf %120, %62 : vector<8x32xf32>
    %124 = arith.mulf %119, %121 : vector<8x32xf32>
    %125 = arith.addf %123, %124 : vector<8x32xf32>
    %126 = math.tanh %125 : vector<8x32xf32>
    %127 = arith.mulf %122, %126 : vector<8x32xf32>
    %cst_43 = arith.constant dense<0.000000e+00> : vector<8x128xf32>
    %128 = tpu.matmul %127, %7, %cst_43 {dimension_numbers = #tpu.dot_dimension_numbers<[1], [0], [0], [1], [0, 0, 1, 1], [], []>} : vector<8x32xf32>, vector<32x128xf32>, vector<8x128xf32> -> vector<8x128xf32>
    %129 = vector.broadcast %8 : vector<1x128xf32> to vector<8x128xf32>
    %130 = arith.addf %128, %129 : vector<8x128xf32>
    %cst_44 = arith.constant dense<0xFF800000> : vector<8xf32>
    %131 = vector.multi_reduction <maximumf>, %130, %cst_44 [1] : vector<8x128xf32> to vector<8xf32>
    %132 = vector.shape_cast %131 : vector<8xf32> to vector<8x1xf32>
    %133 = vector.broadcast %132 : vector<8x1xf32> to vector<8x128xf32>
    %134 = arith.subf %130, %133 : vector<8x128xf32>
    %135 = math.exp %134 : vector<8x128xf32>
    %cst_45 = arith.constant dense<0.000000e+00> : vector<8xf32>
    %136 = vector.multi_reduction <add>, %135, %cst_45 [1] : vector<8x128xf32> to vector<8xf32>
    %137 = vector.shape_cast %136 : vector<8xf32> to vector<8x1xf32>
    %138 = math.log %137 : vector<8x1xf32>
    %139 = arith.addf %138, %132 : vector<8x1xf32>
    %140 = vector.broadcast %139 : vector<8x1xf32> to vector<8x128xf32>
    %141 = arith.subf %130, %140 : vector<8x128xf32>
    %142 = arith.index_cast %c1_i32 : i32 to index
    %c0_46 = arith.constant 0 : index
    %c0_47 = arith.constant 0 : index
    %143 = vector.load %arg10[%142, %c0_46, %c0_47] : memref<8x8x128xf32, #tpu.memory_space<vmem>>, vector<1x8x128xf32>
    %144 = vector.shape_cast %143 : vector<1x8x128xf32> to vector<8x128xf32>
    %145 = vector.shape_cast %141 : vector<8x128xf32> to vector<1x8x128xf32>
    tpu.vector_store %arg10[%142, %c0_46, %c0_47], %145 {strides = array<i32>} : memref<8x8x128xf32, #tpu.memory_space<vmem>>, vector<1x8x128xf32>,
    %c2_i32 = arith.constant 2 : i32
    %146 = arith.index_cast %c2_i32 : i32 to index
    %c0_48 = arith.constant 0 : index
    %c0_49 = arith.constant 0 : index
    %147 = vector.load %arg1[%146, %c0_48, %c0_49] : memref<8x8x128xf32, #tpu.memory_space<vmem>>, vector<1x8x128xf32>
    %148 = vector.shape_cast %147 : vector<1x8x128xf32> to vector<8x128xf32>
    %cst_50 = arith.constant dense<0.000000e+00> : vector<8x128xf32>
    %149 = tpu.matmul %103, %6, %cst_50 {dimension_numbers = #tpu.dot_dimension_numbers<[1], [0], [0], [1], [0, 0, 1, 1], [], []>} : vector<8x32xf32>, vector<32x128xf32>, vector<8x128xf32> -> vector<8x128xf32>
    %150 = arith.addf %148, %149 : vector<8x128xf32>
    %151 = math.tanh %150 : vector<8x128xf32>
    %152 = arith.negf %150 : vector<8x128xf32>
    %153 = math.exp %152 : vector<8x128xf32>
    %cst_51 = arith.constant 1.000000e+00 : f32
    %154 = vector.broadcast %cst_51 : f32 to vector<8x128xf32>
    %155 = arith.addf %154, %153 : vector<8x128xf32>
    %156 = arith.divf %154, %155 : vector<8x128xf32>
    %157 = arith.select %5, %151, %156 : vector<8x128xi1>, vector<8x128xf32>
    %158 = vector.extract_strided_slice %157 {offsets = [0, 0], sizes = [8, 32], strides = [1, 1]} : vector<8x128xf32> to vector<8x32xf32>
    %159 = vector.extract_strided_slice %157 {offsets = [0, 32], sizes = [8, 32], strides = [1, 1]} : vector<8x128xf32> to vector<8x32xf32>
    %160 = vector.extract_strided_slice %157 {offsets = [0, 64], sizes = [8, 32], strides = [1, 1]} : vector<8x128xf32> to vector<8x32xf32>
    %161 = vector.extract_strided_slice %157 {offsets = [0, 96], sizes = [8, 32], strides = [1, 1]} : vector<8x128xf32> to vector<8x32xf32>
    %162 = arith.mulf %159, %101 : vector<8x32xf32>
    %163 = arith.mulf %158, %160 : vector<8x32xf32>
    %164 = arith.addf %162, %163 : vector<8x32xf32>
    %165 = math.tanh %164 : vector<8x32xf32>
    %166 = arith.mulf %161, %165 : vector<8x32xf32>
    %167 = vector.shape_cast %9 : vector<1x32x128xf32> to vector<32x128xf32>
    %cst_52 = arith.constant dense<0.000000e+00> : vector<8x128xf32>
    %168 = tpu.matmul %166, %167, %cst_52 {dimension_numbers = #tpu.dot_dimension_numbers<[1], [0], [0], [1], [0, 0, 1, 1], [], []>} : vector<8x32xf32>, vector<32x128xf32>, vector<8x128xf32> -> vector<8x128xf32>
    %169 = vector.shape_cast %10 : vector<1x32x128xf32> to vector<32x128xf32>
    %cst_53 = arith.constant dense<0.000000e+00> : vector<8x128xf32>
    %170 = tpu.matmul %127, %169, %cst_53 {dimension_numbers = #tpu.dot_dimension_numbers<[1], [0], [0], [1], [0, 0, 1, 1], [], []>} : vector<8x32xf32>, vector<32x128xf32>, vector<8x128xf32> -> vector<8x128xf32>
    %171 = arith.addf %168, %170 : vector<8x128xf32>
    %172 = vector.shape_cast %11 : vector<1x1x128xf32> to vector<1x128xf32>
    %173 = vector.broadcast %172 : vector<1x128xf32> to vector<8x128xf32>
    %174 = arith.addf %171, %173 : vector<8x128xf32>
    %175 = math.tanh %174 : vector<8x128xf32>
    %176 = arith.negf %174 : vector<8x128xf32>
    %177 = math.exp %176 : vector<8x128xf32>
    %cst_54 = arith.constant 1.000000e+00 : f32
    %178 = vector.broadcast %cst_54 : f32 to vector<8x128xf32>
    %179 = arith.addf %178, %177 : vector<8x128xf32>
    %180 = arith.divf %178, %179 : vector<8x128xf32>
    %181 = arith.select %5, %175, %180 : vector<8x128xi1>, vector<8x128xf32>
    %182 = vector.extract_strided_slice %181 {offsets = [0, 0], sizes = [8, 32], strides = [1, 1]} : vector<8x128xf32> to vector<8x32xf32>
    %183 = vector.extract_strided_slice %181 {offsets = [0, 32], sizes = [8, 32], strides = [1, 1]} : vector<8x128xf32> to vector<8x32xf32>
    %184 = vector.extract_strided_slice %181 {offsets = [0, 64], sizes = [8, 32], strides = [1, 1]} : vector<8x128xf32> to vector<8x32xf32>
    %185 = vector.extract_strided_slice %181 {offsets = [0, 96], sizes = [8, 32], strides = [1, 1]} : vector<8x128xf32> to vector<8x32xf32>
    %186 = arith.mulf %183, %125 : vector<8x32xf32>
    %187 = arith.mulf %182, %184 : vector<8x32xf32>
    %188 = arith.addf %186, %187 : vector<8x32xf32>
    %189 = math.tanh %188 : vector<8x32xf32>
    %190 = arith.mulf %185, %189 : vector<8x32xf32>
    %cst_55 = arith.constant dense<0.000000e+00> : vector<8x128xf32>
    %191 = tpu.matmul %190, %7, %cst_55 {dimension_numbers = #tpu.dot_dimension_numbers<[1], [0], [0], [1], [0, 0, 1, 1], [], []>} : vector<8x32xf32>, vector<32x128xf32>, vector<8x128xf32> -> vector<8x128xf32>
    %192 = vector.broadcast %8 : vector<1x128xf32> to vector<8x128xf32>
    %193 = arith.addf %191, %192 : vector<8x128xf32>
    %cst_56 = arith.constant dense<0xFF800000> : vector<8xf32>
    %194 = vector.multi_reduction <maximumf>, %193, %cst_56 [1] : vector<8x128xf32> to vector<8xf32>
    %195 = vector.shape_cast %194 : vector<8xf32> to vector<8x1xf32>
    %196 = vector.broadcast %195 : vector<8x1xf32> to vector<8x128xf32>
    %197 = arith.subf %193, %196 : vector<8x128xf32>
    %198 = math.exp %197 : vector<8x128xf32>
    %cst_57 = arith.constant dense<0.000000e+00> : vector<8xf32>
    %199 = vector.multi_reduction <add>, %198, %cst_57 [1] : vector<8x128xf32> to vector<8xf32>
    %200 = vector.shape_cast %199 : vector<8xf32> to vector<8x1xf32>
    %201 = math.log %200 : vector<8x1xf32>
    %202 = arith.addf %201, %195 : vector<8x1xf32>
    %203 = vector.broadcast %202 : vector<8x1xf32> to vector<8x128xf32>
    %204 = arith.subf %193, %203 : vector<8x128xf32>
    %205 = arith.index_cast %c2_i32 : i32 to index
    %c0_58 = arith.constant 0 : index
    %c0_59 = arith.constant 0 : index
    %206 = vector.load %arg10[%205, %c0_58, %c0_59] : memref<8x8x128xf32, #tpu.memory_space<vmem>>, vector<1x8x128xf32>
    %207 = vector.shape_cast %206 : vector<1x8x128xf32> to vector<8x128xf32>
    %208 = vector.shape_cast %204 : vector<8x128xf32> to vector<1x8x128xf32>
    tpu.vector_store %arg10[%205, %c0_58, %c0_59], %208 {strides = array<i32>} : memref<8x8x128xf32, #tpu.memory_space<vmem>>, vector<1x8x128xf32>,
    %c3_i32 = arith.constant 3 : i32
    %209 = arith.index_cast %c3_i32 : i32 to index
    %c0_60 = arith.constant 0 : index
    %c0_61 = arith.constant 0 : index
    %210 = vector.load %arg1[%209, %c0_60, %c0_61] : memref<8x8x128xf32, #tpu.memory_space<vmem>>, vector<1x8x128xf32>
    %211 = vector.shape_cast %210 : vector<1x8x128xf32> to vector<8x128xf32>
    %cst_62 = arith.constant dense<0.000000e+00> : vector<8x128xf32>
    %212 = tpu.matmul %166, %6, %cst_62 {dimension_numbers = #tpu.dot_dimension_numbers<[1], [0], [0], [1], [0, 0, 1, 1], [], []>} : vector<8x32xf32>, vector<32x128xf32>, vector<8x128xf32> -> vector<8x128xf32>
    %213 = arith.addf %211, %212 : vector<8x128xf32>
    %214 = math.tanh %213 : vector<8x128xf32>
    %215 = arith.negf %213 : vector<8x128xf32>
    %216 = math.exp %215 : vector<8x128xf32>
    %cst_63 = arith.constant 1.000000e+00 : f32
    %217 = vector.broadcast %cst_63 : f32 to vector<8x128xf32>
    %218 = arith.addf %217, %216 : vector<8x128xf32>
    %219 = arith.divf %217, %218 : vector<8x128xf32>
    %220 = arith.select %5, %214, %219 : vector<8x128xi1>, vector<8x128xf32>
    %221 = vector.extract_strided_slice %220 {offsets = [0, 0], sizes = [8, 32], strides = [1, 1]} : vector<8x128xf32> to vector<8x32xf32>
    %222 = vector.extract_strided_slice %220 {offsets = [0, 32], sizes = [8, 32], strides = [1, 1]} : vector<8x128xf32> to vector<8x32xf32>
    %223 = vector.extract_strided_slice %220 {offsets = [0, 64], sizes = [8, 32], strides = [1, 1]} : vector<8x128xf32> to vector<8x32xf32>
    %224 = vector.extract_strided_slice %220 {offsets = [0, 96], sizes = [8, 32], strides = [1, 1]} : vector<8x128xf32> to vector<8x32xf32>
    %225 = arith.mulf %222, %164 : vector<8x32xf32>
    %226 = arith.mulf %221, %223 : vector<8x32xf32>
    %227 = arith.addf %225, %226 : vector<8x32xf32>
    %228 = math.tanh %227 : vector<8x32xf32>
    %229 = arith.mulf %224, %228 : vector<8x32xf32>
    %230 = vector.shape_cast %9 : vector<1x32x128xf32> to vector<32x128xf32>
    %cst_64 = arith.constant dense<0.000000e+00> : vector<8x128xf32>
    %231 = tpu.matmul %229, %230, %cst_64 {dimension_numbers = #tpu.dot_dimension_numbers<[1], [0], [0], [1], [0, 0, 1, 1], [], []>} : vector<8x32xf32>, vector<32x128xf32>, vector<8x128xf32> -> vector<8x128xf32>
    %232 = vector.shape_cast %10 : vector<1x32x128xf32> to vector<32x128xf32>
    %cst_65 = arith.constant dense<0.000000e+00> : vector<8x128xf32>
    %233 = tpu.matmul %190, %232, %cst_65 {dimension_numbers = #tpu.dot_dimension_numbers<[1], [0], [0], [1], [0, 0, 1, 1], [], []>} : vector<8x32xf32>, vector<32x128xf32>, vector<8x128xf32> -> vector<8x128xf32>
    %234 = arith.addf %231, %233 : vector<8x128xf32>
    %235 = vector.shape_cast %11 : vector<1x1x128xf32> to vector<1x128xf32>
    %236 = vector.broadcast %235 : vector<1x128xf32> to vector<8x128xf32>
    %237 = arith.addf %234, %236 : vector<8x128xf32>
    %238 = math.tanh %237 : vector<8x128xf32>
    %239 = arith.negf %237 : vector<8x128xf32>
    %240 = math.exp %239 : vector<8x128xf32>
    %cst_66 = arith.constant 1.000000e+00 : f32
    %241 = vector.broadcast %cst_66 : f32 to vector<8x128xf32>
    %242 = arith.addf %241, %240 : vector<8x128xf32>
    %243 = arith.divf %241, %242 : vector<8x128xf32>
    %244 = arith.select %5, %238, %243 : vector<8x128xi1>, vector<8x128xf32>
    %245 = vector.extract_strided_slice %244 {offsets = [0, 0], sizes = [8, 32], strides = [1, 1]} : vector<8x128xf32> to vector<8x32xf32>
    %246 = vector.extract_strided_slice %244 {offsets = [0, 32], sizes = [8, 32], strides = [1, 1]} : vector<8x128xf32> to vector<8x32xf32>
    %247 = vector.extract_strided_slice %244 {offsets = [0, 64], sizes = [8, 32], strides = [1, 1]} : vector<8x128xf32> to vector<8x32xf32>
    %248 = vector.extract_strided_slice %244 {offsets = [0, 96], sizes = [8, 32], strides = [1, 1]} : vector<8x128xf32> to vector<8x32xf32>
    %249 = arith.mulf %246, %188 : vector<8x32xf32>
    %250 = arith.mulf %245, %247 : vector<8x32xf32>
    %251 = arith.addf %249, %250 : vector<8x32xf32>
    %252 = math.tanh %251 : vector<8x32xf32>
    %253 = arith.mulf %248, %252 : vector<8x32xf32>
    %cst_67 = arith.constant dense<0.000000e+00> : vector<8x128xf32>
    %254 = tpu.matmul %253, %7, %cst_67 {dimension_numbers = #tpu.dot_dimension_numbers<[1], [0], [0], [1], [0, 0, 1, 1], [], []>} : vector<8x32xf32>, vector<32x128xf32>, vector<8x128xf32> -> vector<8x128xf32>
    %255 = vector.broadcast %8 : vector<1x128xf32> to vector<8x128xf32>
    %256 = arith.addf %254, %255 : vector<8x128xf32>
    %cst_68 = arith.constant dense<0xFF800000> : vector<8xf32>
    %257 = vector.multi_reduction <maximumf>, %256, %cst_68 [1] : vector<8x128xf32> to vector<8xf32>
    %258 = vector.shape_cast %257 : vector<8xf32> to vector<8x1xf32>
    %259 = vector.broadcast %258 : vector<8x1xf32> to vector<8x128xf32>
    %260 = arith.subf %256, %259 : vector<8x128xf32>
    %261 = math.exp %260 : vector<8x128xf32>
    %cst_69 = arith.constant dense<0.000000e+00> : vector<8xf32>
    %262 = vector.multi_reduction <add>, %261, %cst_69 [1] : vector<8x128xf32> to vector<8xf32>
    %263 = vector.shape_cast %262 : vector<8xf32> to vector<8x1xf32>
    %264 = math.log %263 : vector<8x1xf32>
    %265 = arith.addf %264, %258 : vector<8x1xf32>
    %266 = vector.broadcast %265 : vector<8x1xf32> to vector<8x128xf32>
    %267 = arith.subf %256, %266 : vector<8x128xf32>
    %268 = arith.index_cast %c3_i32 : i32 to index
    %c0_70 = arith.constant 0 : index
    %c0_71 = arith.constant 0 : index
    %269 = vector.load %arg10[%268, %c0_70, %c0_71] : memref<8x8x128xf32, #tpu.memory_space<vmem>>, vector<1x8x128xf32>
    %270 = vector.shape_cast %269 : vector<1x8x128xf32> to vector<8x128xf32>
    %271 = vector.shape_cast %267 : vector<8x128xf32> to vector<1x8x128xf32>
    tpu.vector_store %arg10[%268, %c0_70, %c0_71], %271 {strides = array<i32>} : memref<8x8x128xf32, #tpu.memory_space<vmem>>, vector<1x8x128xf32>,
    %c4_i32 = arith.constant 4 : i32
    %272 = arith.index_cast %c4_i32 : i32 to index
    %c0_72 = arith.constant 0 : index
    %c0_73 = arith.constant 0 : index
    %273 = vector.load %arg1[%272, %c0_72, %c0_73] : memref<8x8x128xf32, #tpu.memory_space<vmem>>, vector<1x8x128xf32>
    %274 = vector.shape_cast %273 : vector<1x8x128xf32> to vector<8x128xf32>
    %cst_74 = arith.constant dense<0.000000e+00> : vector<8x128xf32>
    %275 = tpu.matmul %229, %6, %cst_74 {dimension_numbers = #tpu.dot_dimension_numbers<[1], [0], [0], [1], [0, 0, 1, 1], [], []>} : vector<8x32xf32>, vector<32x128xf32>, vector<8x128xf32> -> vector<8x128xf32>
    %276 = arith.addf %274, %275 : vector<8x128xf32>
    %277 = math.tanh %276 : vector<8x128xf32>
    %278 = arith.negf %276 : vector<8x128xf32>
    %279 = math.exp %278 : vector<8x128xf32>
    %cst_75 = arith.constant 1.000000e+00 : f32
    %280 = vector.broadcast %cst_75 : f32 to vector<8x128xf32>
    %281 = arith.addf %280, %279 : vector<8x128xf32>
    %282 = arith.divf %280, %281 : vector<8x128xf32>
    %283 = arith.select %5, %277, %282 : vector<8x128xi1>, vector<8x128xf32>
    %284 = vector.extract_strided_slice %283 {offsets = [0, 0], sizes = [8, 32], strides = [1, 1]} : vector<8x128xf32> to vector<8x32xf32>
    %285 = vector.extract_strided_slice %283 {offsets = [0, 32], sizes = [8, 32], strides = [1, 1]} : vector<8x128xf32> to vector<8x32xf32>
    %286 = vector.extract_strided_slice %283 {offsets = [0, 64], sizes = [8, 32], strides = [1, 1]} : vector<8x128xf32> to vector<8x32xf32>
    %287 = vector.extract_strided_slice %283 {offsets = [0, 96], sizes = [8, 32], strides = [1, 1]} : vector<8x128xf32> to vector<8x32xf32>
    %288 = arith.mulf %285, %227 : vector<8x32xf32>
    %289 = arith.mulf %284, %286 : vector<8x32xf32>
    %290 = arith.addf %288, %289 : vector<8x32xf32>
    %291 = math.tanh %290 : vector<8x32xf32>
    %292 = arith.mulf %287, %291 : vector<8x32xf32>
    %293 = vector.shape_cast %9 : vector<1x32x128xf32> to vector<32x128xf32>
    %cst_76 = arith.constant dense<0.000000e+00> : vector<8x128xf32>
    %294 = tpu.matmul %292, %293, %cst_76 {dimension_numbers = #tpu.dot_dimension_numbers<[1], [0], [0], [1], [0, 0, 1, 1], [], []>} : vector<8x32xf32>, vector<32x128xf32>, vector<8x128xf32> -> vector<8x128xf32>
    %295 = vector.shape_cast %10 : vector<1x32x128xf32> to vector<32x128xf32>
    %cst_77 = arith.constant dense<0.000000e+00> : vector<8x128xf32>
    %296 = tpu.matmul %253, %295, %cst_77 {dimension_numbers = #tpu.dot_dimension_numbers<[1], [0], [0], [1], [0, 0, 1, 1], [], []>} : vector<8x32xf32>, vector<32x128xf32>, vector<8x128xf32> -> vector<8x128xf32>
    %297 = arith.addf %294, %296 : vector<8x128xf32>
    %298 = vector.shape_cast %11 : vector<1x1x128xf32> to vector<1x128xf32>
    %299 = vector.broadcast %298 : vector<1x128xf32> to vector<8x128xf32>
    %300 = arith.addf %297, %299 : vector<8x128xf32>
    %301 = math.tanh %300 : vector<8x128xf32>
    %302 = arith.negf %300 : vector<8x128xf32>
    %303 = math.exp %302 : vector<8x128xf32>
    %cst_78 = arith.constant 1.000000e+00 : f32
    %304 = vector.broadcast %cst_78 : f32 to vector<8x128xf32>
    %305 = arith.addf %304, %303 : vector<8x128xf32>
    %306 = arith.divf %304, %305 : vector<8x128xf32>
    %307 = arith.select %5, %301, %306 : vector<8x128xi1>, vector<8x128xf32>
    %308 = vector.extract_strided_slice %307 {offsets = [0, 0], sizes = [8, 32], strides = [1, 1]} : vector<8x128xf32> to vector<8x32xf32>
    %309 = vector.extract_strided_slice %307 {offsets = [0, 32], sizes = [8, 32], strides = [1, 1]} : vector<8x128xf32> to vector<8x32xf32>
    %310 = vector.extract_strided_slice %307 {offsets = [0, 64], sizes = [8, 32], strides = [1, 1]} : vector<8x128xf32> to vector<8x32xf32>
    %311 = vector.extract_strided_slice %307 {offsets = [0, 96], sizes = [8, 32], strides = [1, 1]} : vector<8x128xf32> to vector<8x32xf32>
    %312 = arith.mulf %309, %251 : vector<8x32xf32>
    %313 = arith.mulf %308, %310 : vector<8x32xf32>
    %314 = arith.addf %312, %313 : vector<8x32xf32>
    %315 = math.tanh %314 : vector<8x32xf32>
    %316 = arith.mulf %311, %315 : vector<8x32xf32>
    %cst_79 = arith.constant dense<0.000000e+00> : vector<8x128xf32>
    %317 = tpu.matmul %316, %7, %cst_79 {dimension_numbers = #tpu.dot_dimension_numbers<[1], [0], [0], [1], [0, 0, 1, 1], [], []>} : vector<8x32xf32>, vector<32x128xf32>, vector<8x128xf32> -> vector<8x128xf32>
    %318 = vector.broadcast %8 : vector<1x128xf32> to vector<8x128xf32>
    %319 = arith.addf %317, %318 : vector<8x128xf32>
    %cst_80 = arith.constant dense<0xFF800000> : vector<8xf32>
    %320 = vector.multi_reduction <maximumf>, %319, %cst_80 [1] : vector<8x128xf32> to vector<8xf32>
    %321 = vector.shape_cast %320 : vector<8xf32> to vector<8x1xf32>
    %322 = vector.broadcast %321 : vector<8x1xf32> to vector<8x128xf32>
    %323 = arith.subf %319, %322 : vector<8x128xf32>
    %324 = math.exp %323 : vector<8x128xf32>
    %cst_81 = arith.constant dense<0.000000e+00> : vector<8xf32>
    %325 = vector.multi_reduction <add>, %324, %cst_81 [1] : vector<8x128xf32> to vector<8xf32>
    %326 = vector.shape_cast %325 : vector<8xf32> to vector<8x1xf32>
    %327 = math.log %326 : vector<8x1xf32>
    %328 = arith.addf %327, %321 : vector<8x1xf32>
    %329 = vector.broadcast %328 : vector<8x1xf32> to vector<8x128xf32>
    %330 = arith.subf %319, %329 : vector<8x128xf32>
    %331 = arith.index_cast %c4_i32 : i32 to index
    %c0_82 = arith.constant 0 : index
    %c0_83 = arith.constant 0 : index
    %332 = vector.load %arg10[%331, %c0_82, %c0_83] : memref<8x8x128xf32, #tpu.memory_space<vmem>>, vector<1x8x128xf32>
    %333 = vector.shape_cast %332 : vector<1x8x128xf32> to vector<8x128xf32>
    %334 = vector.shape_cast %330 : vector<8x128xf32> to vector<1x8x128xf32>
    tpu.vector_store %arg10[%331, %c0_82, %c0_83], %334 {strides = array<i32>} : memref<8x8x128xf32, #tpu.memory_space<vmem>>, vector<1x8x128xf32>,
    %c5_i32 = arith.constant 5 : i32
    %335 = arith.index_cast %c5_i32 : i32 to index
    %c0_84 = arith.constant 0 : index
    %c0_85 = arith.constant 0 : index
    %336 = vector.load %arg1[%335, %c0_84, %c0_85] : memref<8x8x128xf32, #tpu.memory_space<vmem>>, vector<1x8x128xf32>
    %337 = vector.shape_cast %336 : vector<1x8x128xf32> to vector<8x128xf32>
    %cst_86 = arith.constant dense<0.000000e+00> : vector<8x128xf32>
    %338 = tpu.matmul %292, %6, %cst_86 {dimension_numbers = #tpu.dot_dimension_numbers<[1], [0], [0], [1], [0, 0, 1, 1], [], []>} : vector<8x32xf32>, vector<32x128xf32>, vector<8x128xf32> -> vector<8x128xf32>
    %339 = arith.addf %337, %338 : vector<8x128xf32>
    %340 = math.tanh %339 : vector<8x128xf32>
    %341 = arith.negf %339 : vector<8x128xf32>
    %342 = math.exp %341 : vector<8x128xf32>
    %cst_87 = arith.constant 1.000000e+00 : f32
    %343 = vector.broadcast %cst_87 : f32 to vector<8x128xf32>
    %344 = arith.addf %343, %342 : vector<8x128xf32>
    %345 = arith.divf %343, %344 : vector<8x128xf32>
    %346 = arith.select %5, %340, %345 : vector<8x128xi1>, vector<8x128xf32>
    %347 = vector.extract_strided_slice %346 {offsets = [0, 0], sizes = [8, 32], strides = [1, 1]} : vector<8x128xf32> to vector<8x32xf32>
    %348 = vector.extract_strided_slice %346 {offsets = [0, 32], sizes = [8, 32], strides = [1, 1]} : vector<8x128xf32> to vector<8x32xf32>
    %349 = vector.extract_strided_slice %346 {offsets = [0, 64], sizes = [8, 32], strides = [1, 1]} : vector<8x128xf32> to vector<8x32xf32>
    %350 = vector.extract_strided_slice %346 {offsets = [0, 96], sizes = [8, 32], strides = [1, 1]} : vector<8x128xf32> to vector<8x32xf32>
    %351 = arith.mulf %348, %290 : vector<8x32xf32>
    %352 = arith.mulf %347, %349 : vector<8x32xf32>
    %353 = arith.addf %351, %352 : vector<8x32xf32>
    %354 = math.tanh %353 : vector<8x32xf32>
    %355 = arith.mulf %350, %354 : vector<8x32xf32>
    %356 = vector.shape_cast %9 : vector<1x32x128xf32> to vector<32x128xf32>
    %cst_88 = arith.constant dense<0.000000e+00> : vector<8x128xf32>
    %357 = tpu.matmul %355, %356, %cst_88 {dimension_numbers = #tpu.dot_dimension_numbers<[1], [0], [0], [1], [0, 0, 1, 1], [], []>} : vector<8x32xf32>, vector<32x128xf32>, vector<8x128xf32> -> vector<8x128xf32>
    %358 = vector.shape_cast %10 : vector<1x32x128xf32> to vector<32x128xf32>
    %cst_89 = arith.constant dense<0.000000e+00> : vector<8x128xf32>
    %359 = tpu.matmul %316, %358, %cst_89 {dimension_numbers = #tpu.dot_dimension_numbers<[1], [0], [0], [1], [0, 0, 1, 1], [], []>} : vector<8x32xf32>, vector<32x128xf32>, vector<8x128xf32> -> vector<8x128xf32>
    %360 = arith.addf %357, %359 : vector<8x128xf32>
    %361 = vector.shape_cast %11 : vector<1x1x128xf32> to vector<1x128xf32>
    %362 = vector.broadcast %361 : vector<1x128xf32> to vector<8x128xf32>
    %363 = arith.addf %360, %362 : vector<8x128xf32>
    %364 = math.tanh %363 : vector<8x128xf32>
    %365 = arith.negf %363 : vector<8x128xf32>
    %366 = math.exp %365 : vector<8x128xf32>
    %cst_90 = arith.constant 1.000000e+00 : f32
    %367 = vector.broadcast %cst_90 : f32 to vector<8x128xf32>
    %368 = arith.addf %367, %366 : vector<8x128xf32>
    %369 = arith.divf %367, %368 : vector<8x128xf32>
    %370 = arith.select %5, %364, %369 : vector<8x128xi1>, vector<8x128xf32>
    %371 = vector.extract_strided_slice %370 {offsets = [0, 0], sizes = [8, 32], strides = [1, 1]} : vector<8x128xf32> to vector<8x32xf32>
    %372 = vector.extract_strided_slice %370 {offsets = [0, 32], sizes = [8, 32], strides = [1, 1]} : vector<8x128xf32> to vector<8x32xf32>
    %373 = vector.extract_strided_slice %370 {offsets = [0, 64], sizes = [8, 32], strides = [1, 1]} : vector<8x128xf32> to vector<8x32xf32>
    %374 = vector.extract_strided_slice %370 {offsets = [0, 96], sizes = [8, 32], strides = [1, 1]} : vector<8x128xf32> to vector<8x32xf32>
    %375 = arith.mulf %372, %314 : vector<8x32xf32>
    %376 = arith.mulf %371, %373 : vector<8x32xf32>
    %377 = arith.addf %375, %376 : vector<8x32xf32>
    %378 = math.tanh %377 : vector<8x32xf32>
    %379 = arith.mulf %374, %378 : vector<8x32xf32>
    %cst_91 = arith.constant dense<0.000000e+00> : vector<8x128xf32>
    %380 = tpu.matmul %379, %7, %cst_91 {dimension_numbers = #tpu.dot_dimension_numbers<[1], [0], [0], [1], [0, 0, 1, 1], [], []>} : vector<8x32xf32>, vector<32x128xf32>, vector<8x128xf32> -> vector<8x128xf32>
    %381 = vector.broadcast %8 : vector<1x128xf32> to vector<8x128xf32>
    %382 = arith.addf %380, %381 : vector<8x128xf32>
    %cst_92 = arith.constant dense<0xFF800000> : vector<8xf32>
    %383 = vector.multi_reduction <maximumf>, %382, %cst_92 [1] : vector<8x128xf32> to vector<8xf32>
    %384 = vector.shape_cast %383 : vector<8xf32> to vector<8x1xf32>
    %385 = vector.broadcast %384 : vector<8x1xf32> to vector<8x128xf32>
    %386 = arith.subf %382, %385 : vector<8x128xf32>
    %387 = math.exp %386 : vector<8x128xf32>
    %cst_93 = arith.constant dense<0.000000e+00> : vector<8xf32>
    %388 = vector.multi_reduction <add>, %387, %cst_93 [1] : vector<8x128xf32> to vector<8xf32>
    %389 = vector.shape_cast %388 : vector<8xf32> to vector<8x1xf32>
    %390 = math.log %389 : vector<8x1xf32>
    %391 = arith.addf %390, %384 : vector<8x1xf32>
    %392 = vector.broadcast %391 : vector<8x1xf32> to vector<8x128xf32>
    %393 = arith.subf %382, %392 : vector<8x128xf32>
    %394 = arith.index_cast %c5_i32 : i32 to index
    %c0_94 = arith.constant 0 : index
    %c0_95 = arith.constant 0 : index
    %395 = vector.load %arg10[%394, %c0_94, %c0_95] : memref<8x8x128xf32, #tpu.memory_space<vmem>>, vector<1x8x128xf32>
    %396 = vector.shape_cast %395 : vector<1x8x128xf32> to vector<8x128xf32>
    %397 = vector.shape_cast %393 : vector<8x128xf32> to vector<1x8x128xf32>
    tpu.vector_store %arg10[%394, %c0_94, %c0_95], %397 {strides = array<i32>} : memref<8x8x128xf32, #tpu.memory_space<vmem>>, vector<1x8x128xf32>,
    %c6_i32 = arith.constant 6 : i32
    %398 = arith.index_cast %c6_i32 : i32 to index
    %c0_96 = arith.constant 0 : index
    %c0_97 = arith.constant 0 : index
    %399 = vector.load %arg1[%398, %c0_96, %c0_97] : memref<8x8x128xf32, #tpu.memory_space<vmem>>, vector<1x8x128xf32>
    %400 = vector.shape_cast %399 : vector<1x8x128xf32> to vector<8x128xf32>
    %cst_98 = arith.constant dense<0.000000e+00> : vector<8x128xf32>
    %401 = tpu.matmul %355, %6, %cst_98 {dimension_numbers = #tpu.dot_dimension_numbers<[1], [0], [0], [1], [0, 0, 1, 1], [], []>} : vector<8x32xf32>, vector<32x128xf32>, vector<8x128xf32> -> vector<8x128xf32>
    %402 = arith.addf %400, %401 : vector<8x128xf32>
    %403 = math.tanh %402 : vector<8x128xf32>
    %404 = arith.negf %402 : vector<8x128xf32>
    %405 = math.exp %404 : vector<8x128xf32>
    %cst_99 = arith.constant 1.000000e+00 : f32
    %406 = vector.broadcast %cst_99 : f32 to vector<8x128xf32>
    %407 = arith.addf %406, %405 : vector<8x128xf32>
    %408 = arith.divf %406, %407 : vector<8x128xf32>
    %409 = arith.select %5, %403, %408 : vector<8x128xi1>, vector<8x128xf32>
    %410 = vector.extract_strided_slice %409 {offsets = [0, 0], sizes = [8, 32], strides = [1, 1]} : vector<8x128xf32> to vector<8x32xf32>
    %411 = vector.extract_strided_slice %409 {offsets = [0, 32], sizes = [8, 32], strides = [1, 1]} : vector<8x128xf32> to vector<8x32xf32>
    %412 = vector.extract_strided_slice %409 {offsets = [0, 64], sizes = [8, 32], strides = [1, 1]} : vector<8x128xf32> to vector<8x32xf32>
    %413 = vector.extract_strided_slice %409 {offsets = [0, 96], sizes = [8, 32], strides = [1, 1]} : vector<8x128xf32> to vector<8x32xf32>
    %414 = arith.mulf %411, %353 : vector<8x32xf32>
    %415 = arith.mulf %410, %412 : vector<8x32xf32>
    %416 = arith.addf %414, %415 : vector<8x32xf32>
    %417 = math.tanh %416 : vector<8x32xf32>
    %418 = arith.mulf %413, %417 : vector<8x32xf32>
    %419 = vector.shape_cast %9 : vector<1x32x128xf32> to vector<32x128xf32>
    %cst_100 = arith.constant dense<0.000000e+00> : vector<8x128xf32>
    %420 = tpu.matmul %418, %419, %cst_100 {dimension_numbers = #tpu.dot_dimension_numbers<[1], [0], [0], [1], [0, 0, 1, 1], [], []>} : vector<8x32xf32>, vector<32x128xf32>, vector<8x128xf32> -> vector<8x128xf32>
    %421 = vector.shape_cast %10 : vector<1x32x128xf32> to vector<32x128xf32>
    %cst_101 = arith.constant dense<0.000000e+00> : vector<8x128xf32>
    %422 = tpu.matmul %379, %421, %cst_101 {dimension_numbers = #tpu.dot_dimension_numbers<[1], [0], [0], [1], [0, 0, 1, 1], [], []>} : vector<8x32xf32>, vector<32x128xf32>, vector<8x128xf32> -> vector<8x128xf32>
    %423 = arith.addf %420, %422 : vector<8x128xf32>
    %424 = vector.shape_cast %11 : vector<1x1x128xf32> to vector<1x128xf32>
    %425 = vector.broadcast %424 : vector<1x128xf32> to vector<8x128xf32>
    %426 = arith.addf %423, %425 : vector<8x128xf32>
    %427 = math.tanh %426 : vector<8x128xf32>
    %428 = arith.negf %426 : vector<8x128xf32>
    %429 = math.exp %428 : vector<8x128xf32>
    %cst_102 = arith.constant 1.000000e+00 : f32
    %430 = vector.broadcast %cst_102 : f32 to vector<8x128xf32>
    %431 = arith.addf %430, %429 : vector<8x128xf32>
    %432 = arith.divf %430, %431 : vector<8x128xf32>
    %433 = arith.select %5, %427, %432 : vector<8x128xi1>, vector<8x128xf32>
    %434 = vector.extract_strided_slice %433 {offsets = [0, 0], sizes = [8, 32], strides = [1, 1]} : vector<8x128xf32> to vector<8x32xf32>
    %435 = vector.extract_strided_slice %433 {offsets = [0, 32], sizes = [8, 32], strides = [1, 1]} : vector<8x128xf32> to vector<8x32xf32>
    %436 = vector.extract_strided_slice %433 {offsets = [0, 64], sizes = [8, 32], strides = [1, 1]} : vector<8x128xf32> to vector<8x32xf32>
    %437 = vector.extract_strided_slice %433 {offsets = [0, 96], sizes = [8, 32], strides = [1, 1]} : vector<8x128xf32> to vector<8x32xf32>
    %438 = arith.mulf %435, %377 : vector<8x32xf32>
    %439 = arith.mulf %434, %436 : vector<8x32xf32>
    %440 = arith.addf %438, %439 : vector<8x32xf32>
    %441 = math.tanh %440 : vector<8x32xf32>
    %442 = arith.mulf %437, %441 : vector<8x32xf32>
    %cst_103 = arith.constant dense<0.000000e+00> : vector<8x128xf32>
    %443 = tpu.matmul %442, %7, %cst_103 {dimension_numbers = #tpu.dot_dimension_numbers<[1], [0], [0], [1], [0, 0, 1, 1], [], []>} : vector<8x32xf32>, vector<32x128xf32>, vector<8x128xf32> -> vector<8x128xf32>
    %444 = vector.broadcast %8 : vector<1x128xf32> to vector<8x128xf32>
    %445 = arith.addf %443, %444 : vector<8x128xf32>
    %cst_104 = arith.constant dense<0xFF800000> : vector<8xf32>
    %446 = vector.multi_reduction <maximumf>, %445, %cst_104 [1] : vector<8x128xf32> to vector<8xf32>
    %447 = vector.shape_cast %446 : vector<8xf32> to vector<8x1xf32>
    %448 = vector.broadcast %447 : vector<8x1xf32> to vector<8x128xf32>
    %449 = arith.subf %445, %448 : vector<8x128xf32>
    %450 = math.exp %449 : vector<8x128xf32>
    %cst_105 = arith.constant dense<0.000000e+00> : vector<8xf32>
    %451 = vector.multi_reduction <add>, %450, %cst_105 [1] : vector<8x128xf32> to vector<8xf32>
    %452 = vector.shape_cast %451 : vector<8xf32> to vector<8x1xf32>
    %453 = math.log %452 : vector<8x1xf32>
    %454 = arith.addf %453, %447 : vector<8x1xf32>
    %455 = vector.broadcast %454 : vector<8x1xf32> to vector<8x128xf32>
    %456 = arith.subf %445, %455 : vector<8x128xf32>
    %457 = arith.index_cast %c6_i32 : i32 to index
    %c0_106 = arith.constant 0 : index
    %c0_107 = arith.constant 0 : index
    %458 = vector.load %arg10[%457, %c0_106, %c0_107] : memref<8x8x128xf32, #tpu.memory_space<vmem>>, vector<1x8x128xf32>
    %459 = vector.shape_cast %458 : vector<1x8x128xf32> to vector<8x128xf32>
    %460 = vector.shape_cast %456 : vector<8x128xf32> to vector<1x8x128xf32>
    tpu.vector_store %arg10[%457, %c0_106, %c0_107], %460 {strides = array<i32>} : memref<8x8x128xf32, #tpu.memory_space<vmem>>, vector<1x8x128xf32>,
    %c7_i32 = arith.constant 7 : i32
    %461 = arith.index_cast %c7_i32 : i32 to index
    %c0_108 = arith.constant 0 : index
    %c0_109 = arith.constant 0 : index
    %462 = vector.load %arg1[%461, %c0_108, %c0_109] : memref<8x8x128xf32, #tpu.memory_space<vmem>>, vector<1x8x128xf32>
    %463 = vector.shape_cast %462 : vector<1x8x128xf32> to vector<8x128xf32>
    %cst_110 = arith.constant dense<0.000000e+00> : vector<8x128xf32>
    %464 = tpu.matmul %418, %6, %cst_110 {dimension_numbers = #tpu.dot_dimension_numbers<[1], [0], [0], [1], [0, 0, 1, 1], [], []>} : vector<8x32xf32>, vector<32x128xf32>, vector<8x128xf32> -> vector<8x128xf32>
    %465 = arith.addf %463, %464 : vector<8x128xf32>
    %466 = math.tanh %465 : vector<8x128xf32>
    %467 = arith.negf %465 : vector<8x128xf32>
    %468 = math.exp %467 : vector<8x128xf32>
    %cst_111 = arith.constant 1.000000e+00 : f32
    %469 = vector.broadcast %cst_111 : f32 to vector<8x128xf32>
    %470 = arith.addf %469, %468 : vector<8x128xf32>
    %471 = arith.divf %469, %470 : vector<8x128xf32>
    %472 = arith.select %5, %466, %471 : vector<8x128xi1>, vector<8x128xf32>
    %473 = vector.extract_strided_slice %472 {offsets = [0, 0], sizes = [8, 32], strides = [1, 1]} : vector<8x128xf32> to vector<8x32xf32>
    %474 = vector.extract_strided_slice %472 {offsets = [0, 32], sizes = [8, 32], strides = [1, 1]} : vector<8x128xf32> to vector<8x32xf32>
    %475 = vector.extract_strided_slice %472 {offsets = [0, 64], sizes = [8, 32], strides = [1, 1]} : vector<8x128xf32> to vector<8x32xf32>
    %476 = vector.extract_strided_slice %472 {offsets = [0, 96], sizes = [8, 32], strides = [1, 1]} : vector<8x128xf32> to vector<8x32xf32>
    %477 = arith.mulf %474, %416 : vector<8x32xf32>
    %478 = arith.mulf %473, %475 : vector<8x32xf32>
    %479 = arith.addf %477, %478 : vector<8x32xf32>
    %480 = math.tanh %479 : vector<8x32xf32>
    %481 = arith.mulf %476, %480 : vector<8x32xf32>
    %482 = vector.shape_cast %9 : vector<1x32x128xf32> to vector<32x128xf32>
    %cst_112 = arith.constant dense<0.000000e+00> : vector<8x128xf32>
    %483 = tpu.matmul %481, %482, %cst_112 {dimension_numbers = #tpu.dot_dimension_numbers<[1], [0], [0], [1], [0, 0, 1, 1], [], []>} : vector<8x32xf32>, vector<32x128xf32>, vector<8x128xf32> -> vector<8x128xf32>
    %484 = vector.shape_cast %10 : vector<1x32x128xf32> to vector<32x128xf32>
    %cst_113 = arith.constant dense<0.000000e+00> : vector<8x128xf32>
    %485 = tpu.matmul %442, %484, %cst_113 {dimension_numbers = #tpu.dot_dimension_numbers<[1], [0], [0], [1], [0, 0, 1, 1], [], []>} : vector<8x32xf32>, vector<32x128xf32>, vector<8x128xf32> -> vector<8x128xf32>
    %486 = arith.addf %483, %485 : vector<8x128xf32>
    %487 = vector.shape_cast %11 : vector<1x1x128xf32> to vector<1x128xf32>
    %488 = vector.broadcast %487 : vector<1x128xf32> to vector<8x128xf32>
    %489 = arith.addf %486, %488 : vector<8x128xf32>
    %490 = math.tanh %489 : vector<8x128xf32>
    %491 = arith.negf %489 : vector<8x128xf32>
    %492 = math.exp %491 : vector<8x128xf32>
    %cst_114 = arith.constant 1.000000e+00 : f32
    %493 = vector.broadcast %cst_114 : f32 to vector<8x128xf32>
    %494 = arith.addf %493, %492 : vector<8x128xf32>
    %495 = arith.divf %493, %494 : vector<8x128xf32>
    %496 = arith.select %5, %490, %495 : vector<8x128xi1>, vector<8x128xf32>
    %497 = vector.extract_strided_slice %496 {offsets = [0, 0], sizes = [8, 32], strides = [1, 1]} : vector<8x128xf32> to vector<8x32xf32>
    %498 = vector.extract_strided_slice %496 {offsets = [0, 32], sizes = [8, 32], strides = [1, 1]} : vector<8x128xf32> to vector<8x32xf32>
    %499 = vector.extract_strided_slice %496 {offsets = [0, 64], sizes = [8, 32], strides = [1, 1]} : vector<8x128xf32> to vector<8x32xf32>
    %500 = vector.extract_strided_slice %496 {offsets = [0, 96], sizes = [8, 32], strides = [1, 1]} : vector<8x128xf32> to vector<8x32xf32>
    %501 = arith.mulf %498, %440 : vector<8x32xf32>
    %502 = arith.mulf %497, %499 : vector<8x32xf32>
    %503 = arith.addf %501, %502 : vector<8x32xf32>
    %504 = math.tanh %503 : vector<8x32xf32>
    %505 = arith.mulf %500, %504 : vector<8x32xf32>
    %cst_115 = arith.constant dense<0.000000e+00> : vector<8x128xf32>
    %506 = tpu.matmul %505, %7, %cst_115 {dimension_numbers = #tpu.dot_dimension_numbers<[1], [0], [0], [1], [0, 0, 1, 1], [], []>} : vector<8x32xf32>, vector<32x128xf32>, vector<8x128xf32> -> vector<8x128xf32>
    %507 = vector.broadcast %8 : vector<1x128xf32> to vector<8x128xf32>
    %508 = arith.addf %506, %507 : vector<8x128xf32>
    %cst_116 = arith.constant dense<0xFF800000> : vector<8xf32>
    %509 = vector.multi_reduction <maximumf>, %508, %cst_116 [1] : vector<8x128xf32> to vector<8xf32>
    %510 = vector.shape_cast %509 : vector<8xf32> to vector<8x1xf32>
    %511 = vector.broadcast %510 : vector<8x1xf32> to vector<8x128xf32>
    %512 = arith.subf %508, %511 : vector<8x128xf32>
    %513 = math.exp %512 : vector<8x128xf32>
    %cst_117 = arith.constant dense<0.000000e+00> : vector<8xf32>
    %514 = vector.multi_reduction <add>, %513, %cst_117 [1] : vector<8x128xf32> to vector<8xf32>
    %515 = vector.shape_cast %514 : vector<8xf32> to vector<8x1xf32>
    %516 = math.log %515 : vector<8x1xf32>
    %517 = arith.addf %516, %510 : vector<8x1xf32>
    %518 = vector.broadcast %517 : vector<8x1xf32> to vector<8x128xf32>
    %519 = arith.subf %508, %518 : vector<8x128xf32>
    %520 = arith.index_cast %c7_i32 : i32 to index
    %c0_118 = arith.constant 0 : index
    %c0_119 = arith.constant 0 : index
    %521 = vector.load %arg10[%520, %c0_118, %c0_119] : memref<8x8x128xf32, #tpu.memory_space<vmem>>, vector<1x8x128xf32>
    %522 = vector.shape_cast %521 : vector<1x8x128xf32> to vector<8x128xf32>
    %523 = vector.shape_cast %519 : vector<8x128xf32> to vector<1x8x128xf32>
    tpu.vector_store %arg10[%520, %c0_118, %c0_119], %523 {strides = array<i32>} : memref<8x8x128xf32, #tpu.memory_space<vmem>>, vector<1x8x128xf32>,
    %c8_i32 = arith.constant 8 : i32
    %c0_120 = arith.constant 0 : index
    %c0_121 = arith.constant 0 : index
    %c0_122 = arith.constant 0 : index
    %524 = vector.load %arg11[%c0_120, %c0_121, %c0_122] : memref<2x8x32xf32, #tpu.memory_space<vmem>>, vector<1x8x32xf32>
    %525 = vector.shape_cast %524 : vector<1x8x32xf32> to vector<8x32xf32>
    %526 = vector.shape_cast %481 : vector<8x32xf32> to vector<1x8x32xf32>
    tpu.vector_store %arg11[%c0_120, %c0_121, %c0_122], %526 {strides = array<i32>} : memref<2x8x32xf32, #tpu.memory_space<vmem>>, vector<1x8x32xf32>,
    %c0_123 = arith.constant 0 : index
    %c0_124 = arith.constant 0 : index
    %c0_125 = arith.constant 0 : index
    %527 = vector.load %arg12[%c0_123, %c0_124, %c0_125] : memref<2x8x32xf32, #tpu.memory_space<vmem>>, vector<1x8x32xf32>
    %528 = vector.shape_cast %527 : vector<1x8x32xf32> to vector<8x32xf32>
    %529 = vector.shape_cast %479 : vector<8x32xf32> to vector<1x8x32xf32>
    tpu.vector_store %arg12[%c0_123, %c0_124, %c0_125], %529 {strides = array<i32>} : memref<2x8x32xf32, #tpu.memory_space<vmem>>, vector<1x8x32xf32>,
    %c1_126 = arith.constant 1 : index
    %c0_127 = arith.constant 0 : index
    %c0_128 = arith.constant 0 : index
    %530 = vector.load %arg11[%c1_126, %c0_127, %c0_128] : memref<2x8x32xf32, #tpu.memory_space<vmem>>, vector<1x8x32xf32>
    %531 = vector.shape_cast %530 : vector<1x8x32xf32> to vector<8x32xf32>
    %532 = vector.shape_cast %505 : vector<8x32xf32> to vector<1x8x32xf32>
    tpu.vector_store %arg11[%c1_126, %c0_127, %c0_128], %532 {strides = array<i32>} : memref<2x8x32xf32, #tpu.memory_space<vmem>>, vector<1x8x32xf32>,
    %c1_129 = arith.constant 1 : index
    %c0_130 = arith.constant 0 : index
    %c0_131 = arith.constant 0 : index
    %533 = vector.load %arg12[%c1_129, %c0_130, %c0_131] : memref<2x8x32xf32, #tpu.memory_space<vmem>>, vector<1x8x32xf32>
    %534 = vector.shape_cast %533 : vector<1x8x32xf32> to vector<8x32xf32>
    %535 = vector.shape_cast %503 : vector<8x32xf32> to vector<1x8x32xf32>
    tpu.vector_store %arg12[%c1_129, %c0_130, %c0_131], %535 {strides = array<i32>} : memref<2x8x32xf32, #tpu.memory_space<vmem>>, vector<1x8x32xf32>,
    return
  }
  func.func @transform_0(%arg0: i32) -> (i32, i32, i32) {
    %c0_i32 = arith.constant 0 : i32
    %c0_i32_0 = arith.constant 0 : i32
    %c0_i32_1 = arith.constant 0 : i32
    %c0_i32_2 = arith.constant 0 : i32
    return %c0_i32, %c0_i32_0, %c0_i32_1 : i32, i32, i32
  }
  func.func @transform_1(%arg0: i32) -> (i32, i32, i32) {
    %c0_i32 = arith.constant 0 : i32
    %c0_i32_0 = arith.constant 0 : i32
    %c0_i32_1 = arith.constant 0 : i32
    %c0_i32_2 = arith.constant 0 : i32
    return %c0_i32, %c0_i32_0, %c0_i32_1 : i32, i32, i32
  }
  func.func @transform_2(%arg0: i32) -> (i32, i32, i32) {
    %c0_i32 = arith.constant 0 : i32
    %c0_i32_0 = arith.constant 0 : i32
    %c0_i32_1 = arith.constant 0 : i32
    %c0_i32_2 = arith.constant 0 : i32
    return %c0_i32, %c0_i32_0, %c0_i32_1 : i32, i32, i32
  }
  func.func @transform_3(%arg0: i32) -> (i32, i32) {
    %c0_i32 = arith.constant 0 : i32
    %c0_i32_0 = arith.constant 0 : i32
    %c0_i32_1 = arith.constant 0 : i32
    return %c0_i32, %c0_i32_0 : i32, i32
  }
  func.func @transform_4(%arg0: i32) -> (i32, i32, i32) {
    %c0_i32 = arith.constant 0 : i32
    %c0_i32_0 = arith.constant 0 : i32
    %c0_i32_1 = arith.constant 0 : i32
    %c0_i32_2 = arith.constant 0 : i32
    return %c0_i32, %c0_i32_0, %c0_i32_1 : i32, i32, i32
  }
  func.func @transform_5(%arg0: i32) -> (i32, i32, i32) {
    %c0_i32 = arith.constant 0 : i32
    %c0_i32_0 = arith.constant 0 : i32
    %c0_i32_1 = arith.constant 0 : i32
    %c0_i32_2 = arith.constant 0 : i32
    return %c0_i32, %c0_i32_0, %c0_i32_1 : i32, i32, i32
  }
  func.func @transform_6(%arg0: i32) -> (i32, i32, i32) {
    %c0_i32 = arith.constant 0 : i32
    %c0_i32_0 = arith.constant 0 : i32
    %c0_i32_1 = arith.constant 0 : i32
    %c0_i32_2 = arith.constant 0 : i32
    return %c0_i32, %c0_i32_0, %c0_i32_1 : i32, i32, i32
  }
  func.func @transform_7(%arg0: i32) -> (i32, i32) {
    %c0_i32 = arith.constant 0 : i32
    %c0_i32_0 = arith.constant 0 : i32
    %c0_i32_1 = arith.constant 0 : i32
    return %c0_i32, %c0_i32_0 : i32, i32
  }
  func.func @transform_8(%arg0: i32) -> (i32, i32) {
    %c0_i32 = arith.constant 0 : i32
    %c0_i32_0 = arith.constant 0 : i32
    %c0_i32_1 = arith.constant 0 : i32
    return %c0_i32, %c0_i32_0 : i32, i32
  }
  func.func @transform_9(%arg0: i32) -> (i32, i32, i32) {
    %c0_i32 = arith.constant 0 : i32
    %c0_i32_0 = arith.constant 0 : i32
    %c0_i32_1 = arith.constant 0 : i32
    %c0_i32_2 = arith.constant 0 : i32
    return %c0_i32, %c0_i32_0, %c0_i32_1 : i32, i32, i32
  }
  func.func @transform_10(%arg0: i32) -> (i32, i32, i32) {
    %c0_i32 = arith.constant 0 : i32
    %c0_i32_0 = arith.constant 0 : i32
    %c0_i32_1 = arith.constant 0 : i32
    %c0_i32_2 = arith.constant 0 : i32
    return %c0_i32, %c0_i32_0, %c0_i32_1 : i32, i32, i32
  }
  func.func @transform_11(%arg0: i32) -> (i32, i32, i32) {
    %c0_i32 = arith.constant 0 : i32
    %c0_i32_0 = arith.constant 0 : i32
    %c0_i32_1 = arith.constant 0 : i32
    %c0_i32_2 = arith.constant 0 : i32
    return %c0_i32, %c0_i32_0, %c0_i32_1 : i32, i32, i32
  }
}

</mosaic_0001>

<bundles_post_ra>
// kernel: tpu_custom_call.1
= control target key start
LH: loop header
LB: loop body
LE: loop exit
PB: predicated region body
PF: predicated region fallthrough
CT: control target
= control target key end

     0   :  { %17 = vsyncpa [#allocation3], 0  ;;  %s4882_s0 = inlined_call_operand.hbm [shape: f32[8,8,128], index: 0, kind: input, shape index: {}]   ;;  %s4883_s1 = inlined_call_operand.hbm [shape: f32[2,8,32], index: 1, kind: input, shape index: {}]   ;;  %s4884_s2 = inlined_call_operand.hbm [shape: f32[2,8,32], index: 2, kind: input, shape index: {}]   ;;  %s4885_s3 = inlined_call_operand.hbm [shape: f32[32,128], index: 3, kind: input, shape index: {}]   ;;  %s4886_s4 = inlined_call_operand.hbm [shape: f32[1,32,128], index: 4, kind: input, shape index: {}]   ;;  %s4887_s5 = inlined_call_operand.hbm [shape: f32[1,32,128], index: 5, kind: input, shape index: {}]   ;;  %s4888_s6 = inlined_call_operand.vmem [shape: f32[1,1,128], index: 6, kind: input, shape index: {}]   ;;  %s4889_s7 = inlined_call_operand.hbm [shape: f32[32,128], index: 7, kind: input, shape index: {}]   ;;  %s4890_s8 = inlined_call_operand.vmem [shape: f32[1,128], index: 8, kind: input, shape index: {}]   ;;  %s4891_s9 = inlined_call_operand.hbm [shape: f32[8,8,128], index: 9, kind: output, shape index: {0}]   ;;  %s4892_s10 = inlined_call_operand.hbm [shape: f32[2,8,32], index: 10, kind: output, shape index: {1}]   ;;  %s4893_s11 = inlined_call_operand.hbm [shape: f32[2,8,32], index: 11, kind: output, shape index: {2}]  }
   0x1   :  { %18 = vsyncpa [#allocation6], 0 }
   0x2   :  { %19 = vsyncpa [#allocation9], 0 }
   0x3   :  { %20 = vsyncpa [#allocation12], 0 }
   0x4   :  { %21 = vsyncpa [#allocation4], 0 }
   0x5   :  { %22 = vsyncpa [#allocation16], 0  ;;  %s4077_s17 = smov [#allocation5]   ;;  %s4078_s19 = smov [#allocation8]  }
   0x6   :  { %s40_s18 = sshll.u32 %s4077_s17, 4  ;;  %s64_s20 = sshll.u32 %s4078_s19, 4  ;;  %s41_s18 = int_to_ptr.vmem [resolvable:$true] %s40_s18  ;;  %s65_s20 = int_to_ptr.vmem [resolvable:$true] %s64_s20 }
   0x7   :  { %s3873_s21 = scalar_lea.vmem %s41_s18, 256  ;;  %p3878_p1 = scmp.lt.s32.totalorder %s41_s18, %s41_s18 }
   0x8   :  { %p3874_p0 = scmp.ne.s32.totalorder %s41_s18, %s3873_s21  ;;  %p3879_p2 = scmp.lt.s32.totalorder %s3873_s21, %s3873_s21 }
   0xa   :  { %p3880_p3 = por %p3879_p2, %p3878_p1 }
   0xc   :  { %p3881_p4 = pnand %p3880_p3, %p3874_p0 }
   0xe   :  { %3884 = shalt.err (!%p3881_p4)
}
   0xf   :  { %s4079_s22 = smov 128   ;;  %s4080_s23 = smov 8  }
  0x10   :  { %46 = dma.hbm_to_vmem [thread:$0]  %s4883_s1, 256, %s41_s18, [#allocation6], %s4079_s22, %s4079_s22, %s4080_s23  }
  0x11   :  { %s3893_s26 = scalar_lea.vmem %s65_s20, 512  ;;  %p3898_p6 = scmp.lt.s32.totalorder %s65_s20, %s65_s20 }
  0x12   :  { %p3894_p5 = scmp.ne.s32.totalorder %s65_s20, %s3893_s26  ;;  %p3899_p7 = scmp.lt.s32.totalorder %s3893_s26, %s3893_s26 }
  0x14   :  { %p3900_p8 = por %p3899_p7, %p3898_p6 }
  0x16   :  { %p3901_p9 = pnand %p3900_p8, %p3894_p5 }
  0x18   :  { %3904 = shalt.err (!%p3901_p9)
}
  0x19   :  { %70 = dma.hbm_to_vmem [thread:$0]  %s4885_s3, 512, %s65_s20, [#allocation9], %s4079_s22, %s4079_s22, %s4080_s23  }
  0x1a   :  { %s4081_s29 = smov [#allocation11]   ;;  %s4082_s12 = smov [#allocation2]  }
  0x1b   :  { %s88_s30 = sshll.u32 %s4081_s29, 4  ;;  %s28_s13 = sshll.u32 %s4082_s12, 4  ;;  %s89_s30 = int_to_ptr.vmem [resolvable:$true] %s88_s30  ;;  %s29_s13 = int_to_ptr.vmem [resolvable:$true] %s28_s13 }
  0x1c   :  { %s3913_s1 = scalar_lea.vmem %s89_s30, 512  ;;  %p3918_p11 = scmp.lt.s32.totalorder %s89_s30, %s89_s30 }
  0x1d   :  { %p3914_p10 = scmp.ne.s32.totalorder %s89_s30, %s3913_s1  ;;  %p3919_p12 = scmp.lt.s32.totalorder %s3913_s1, %s3913_s1 }
  0x1f   :  { %p3920_p13 = por %p3919_p12, %p3918_p11 }
  0x21   :  { %p3921_p0 = pnand %p3920_p13, %p3914_p10 }
  0x23   :  { %3924 = shalt.err (!%p3921_p0)
}
  0x24   :  { %94 = dma.hbm_to_vmem [thread:$0]  %s4887_s5, 512, %s89_s30, [#allocation12], %s4079_s22, %s4079_s22, %s4080_s23  }
  0x25   :  { %s3933_s3 = scalar_lea.vmem %s29_s13, 1024  ;;  %p3938_p2 = scmp.lt.s32.totalorder %s29_s13, %s29_s13 }
  0x26   :  { %p3934_p1 = scmp.ne.s32.totalorder %s29_s13, %s3933_s3  ;;  %p3939_p3 = scmp.lt.s32.totalorder %s3933_s3, %s3933_s3 }
  0x28   :  { %p3940_p4 = por %p3939_p3, %p3938_p2 }
  0x2a   :  { %p3941_p5 = pnand %p3940_p4, %p3934_p1 }
  0x2c   :  { %3944 = shalt.err (!%p3941_p5)
}
  0x2d   :  { %34 = dma.hbm_to_vmem [thread:$0]  %s4882_s0, 1024, %s29_s13, [#allocation3], %s4079_s22, %s4079_s22, %s4080_s23  }
  0x2e   :  { %s4083_s18 = smov [#allocation7]   ;;  %s4084_s20 = smov [#allocation10]  }
  0x2f   :  { %s52_s19 = sshll.u32 %s4083_s18, 4  ;;  %s76_s21 = sshll.u32 %s4084_s20, 4  ;;  %s53_s19 = int_to_ptr.vmem [resolvable:$true] %s52_s19  ;;  %s77_s21 = int_to_ptr.vmem [resolvable:$true] %s76_s21 }
  0x30   :  { %s3953_s5 = scalar_lea.vmem %s53_s19, 256  ;;  %p3958_p7 = scmp.lt.s32.totalorder %s53_s19, %s53_s19 }
  0x31   :  { %p3954_p6 = scmp.ne.s32.totalorder %s53_s19, %s3953_s5  ;;  %p3959_p8 = scmp.lt.s32.totalorder %s3953_s5, %s3953_s5 }
  0x33   :  { %p3960_p9 = por %p3959_p8, %p3958_p7 }
  0x35   :  { %p3961_p10 = pnand %p3960_p9, %p3954_p6 }
  0x37   :  { %3964 = shalt.err (!%p3961_p10)
}
  0x38   :  { %58 = dma.hbm_to_vmem [thread:$0]  %s4884_s2, 256, %s53_s19, [#allocation6], %s4079_s22, %s4079_s22, %s4080_s23  }
  0x39   :  { %s3973_s0 = scalar_lea.vmem %s77_s21, 512  ;;  %p3978_p12 = scmp.lt.s32.totalorder %s77_s21, %s77_s21 }
  0x3a   :  { %p3974_p11 = scmp.ne.s32.totalorder %s77_s21, %s3973_s0  ;;  %p3979_p13 = scmp.lt.s32.totalorder %s3973_s0, %s3973_s0 }
  0x3c   :  { %p3980_p0 = por %p3979_p13, %p3978_p12 }
  0x3e   :  { %p3981_p1 = pnand %p3980_p0, %p3974_p11 }
  0x40   :  { %3984 = shalt.err (!%p3981_p1)
}
  0x41   :  { %82 = dma.hbm_to_vmem [thread:$0]  %s4886_s4, 512, %s77_s21, [#allocation9], %s4079_s22, %s4079_s22, %s4080_s23  }
  0x42   :  { %s4085_s28 = smov [#allocation13]  }
  0x43   :  { %s102_s29 = sshll.u32 %s4085_s28, 4  ;;  %s103_s29 = int_to_ptr.vmem [resolvable:$true] %s102_s29 }
  0x44   :  { %s3993_s30 = scalar_lea.vmem %s103_s29, 512  ;;  %p3998_p3 = scmp.lt.s32.totalorder %s103_s29, %s103_s29 }
  0x45   :  { %p3994_p2 = scmp.ne.s32.totalorder %s103_s29, %s3993_s30  ;;  %p3999_p4 = scmp.lt.s32.totalorder %s3993_s30, %s3993_s30 }
  0x47   :  { %p4000_p5 = por %p3999_p4, %p3998_p3 }
  0x49   :  { %p4001_p6 = pnand %p4000_p5, %p3994_p2 }
  0x4b   :  { %4004 = shalt.err (!%p4001_p6)
}
  0x4c   :  { %108 = dma.hbm_to_vmem [thread:$0]  %s4889_s7, 512, %s103_s29, [#allocation12], %s4079_s22, %s4079_s22, %s4080_s23  }
  0x4d   :  { %4065 = dma.done.wait [#allocation3], 1024  }
  0x4e   :  { %4066 = vsyncadd [#allocation3], 4294966272 }
  0x4f   :  { %4067 = dma.done.wait [#allocation6], 512  }
  0x50   :  { %4068 = vsyncadd [#allocation6], 4294966784 }
  0x51   :  { %4069 = dma.done.wait [#allocation9], 1024  }
  0x52   :  { %4070 = vsyncadd [#allocation9], 4294966272 }
  0x53   :  { %4071 = dma.done.wait [#allocation12], 1024  }
  0x54   :  { %4072 = vsyncadd [#allocation12], 4294966272  ;;  %v4086_v0 = vmov 0.0   ;;  %vm4087_vm0 = vmmov 0   ;;  %v4202_v1 = vld [vmem:[#allocation8 + $0x18] sm:$0xff]  ;;  %v4204_v2 = vld [vmem:[#allocation8 + $0x10] sm:$0xff]  ;;  %v132_v13 = vlaneseq }
  0x55   :  { %3319 = vmatprep.subr.mxu0 %v4086_v0  ;;  %3327 = vmatprep.mubr.msk.f32.mxu0 %vm4087_vm0, %v4086_v0  ;;  %v4208_v3 = vld [vmem:[#allocation8 + $0x8] sm:$0xff]  ;;  %v4212_v4 = vld [vmem:[#allocation8] sm:$0xff]  ;;  %vm162_vm1 = vcmask 261120   ;;  %s4088_s4 = smov 64   ;;  %v158_v19 = vld [vmem:[#allocation7] sm:$0xff]  ;;  %s4089_s7 = smov 32  }
  0x56   :  { %3330 = vmatprep.subr.mxu1 %v4086_v0  ;;  %3338 = vmatprep.mubr.msk.f32.mxu1 %vm4087_vm0, %v4086_v0  ;;  %v155_v5 = vld [vmem:[#allocation5] sm:$0xff]  ;;  %v133_v14 = vand.u32 127, %v132_v13  ;;  %v4233_v26 = vld [vmem:[#allocation11 + $0x18] sm:$0xff]  ;;  %v4237_v28 = vld [vmem:[#allocation11 + $0x10] sm:$0xff]  ;;  %s4091_s16 = smov [#allocation15]  }
  0x57   :  { %3320 = vmatpush3.msra.mxu0 %v4202_v1  ;;  %v161_v6 = vld [vmem:[#allocation2] sm:$0xff]  ;;  %v4235_v27 = vld [vmem:[#allocation10 + $0x18] sm:$0xff]  ;;  %3331 = vmatpush3.msra.mxu1 %v4233_v26  ;;  %v4241_v29 = vld [vmem:[#allocation10 + $0x10] sm:$0xff]  ;;  %s3075_s17 = sshll.u32 %s4091_s16, 4  ;;  %s3076_s17 = int_to_ptr.vmem [resolvable:$true] %s3075_s17 }
  0x58   :  { %3321 = vmatprep.subr.mxu0 %v4086_v0  ;;  %vm134_vm2 = vcmp.ge.s32.totalorder %v133_v14, 64  ;;  %vm135_vm3 = vcmp.lt.s32.totalorder %v133_v14, 96  ;;  %3332 = vmatprep.subr.mxu1 %v4086_v0  ;;  %v4245_v30 = vld [vmem:[#allocation11 + $0x8] sm:$0xff]  ;;  %v4253_v32 = vld [vmem:[#allocation11] sm:$0xff]  ;;  %v160_v59 = vld [vmem:[#allocation7 + $0x8] sm:$0xff]  ;;  %s4005_s18 = scalar_lea.vmem %s3076_s17, 256  ;;  %p4010_p8 = scmp.lt.s32.totalorder %s3076_s17, %s3076_s17 }
  0x59   :  { %3322 = vmatpush3.msra.mxu0 %v4204_v2  ;;  %vm4221_vm4 = vmand %vm134_vm2, %vm135_vm3  ;;  %v4247_v31 = vld [vmem:[#allocation10 + $0x8] sm:$0xff]  ;;  %3333 = vmatpush3.msra.mxu1 %v4237_v28  ;;  %v4255_v33 = vld [vmem:[#allocation10] sm:$0xff]  ;;  %p4006_p7 = scmp.ne.s32.totalorder %s3076_s17, %s4005_s18  ;;  %p4011_p9 = scmp.lt.s32.totalorder %s4005_s18, %s4005_s18 }
  0x5a   :  { %3323 = vmatprep.subr.mxu0 %v4086_v0  ;;  %3334 = vmatprep.subr.mxu1 %v4086_v0  ;;  %v157_v34 = vld [vmem:[#allocation5 + $0x8] sm:$0xff]  ;;  %v4295_v41 = vld [vmem:[%s4888_s6] ss:$0 sm:$0xff] }
  0x5b   :  { %3324 = vmatpush3.msra.mxu0 %v4208_v3  ;;  %3335 = vmatpush3.msra.mxu1 %v4245_v30  ;;  %v544_v47 = vld [vmem:[#allocation2 + $0x8] sm:$0xff]  ;;  %v4804_v15 = vld [vmem:[%s4890_s8] ss:$0 sm:$0xff]  ;;  %s4090_s8 = smov 96   ;;  %p4012_p10 = por %p4011_p9, %p4010_p8 }
  0x5c   :  { %3325 = vmatprep.subr.mxu0 %v4086_v0  ;;  %3336 = vmatprep.subr.mxu1 %v4086_v0 }
  0x5d   :  { %3326 = vmatpush3.msra.mxu0 %v4212_v4  ;;  %3337 = vmatpush3.msra.mxu1 %v4253_v32  ;;  %p4013_p11 = pnand %p4012_p10, %p4006_p7 }
  0x5e   :  { %3328 = vmatmul.mubr.msk.f32.vlgmr.msra.gmra.mxu0 %vm162_vm1, %v155_v5  ;;  %3341 = vmatprep.subr.mxu0 %v4086_v0 }
  0x5f   :  { %3349 = vmatprep.mubr.msk.f32.mxu0 %vm4087_vm0, %v4086_v0  ;;  %3342 = vmatpush3.msra.mxu0 %v4235_v27 }
  0x60   :  { %3343 = vmatprep.subr.mxu0 %v4086_v0  ;;  %3339 = vmatmul.mubr.msk.f32.vlgmr.msra.gmra.mxu1 %vm162_vm1, %v157_v34 }
  0x61   :  { %3344 = vmatpush3.msra.mxu0 %v4241_v29  ;;  %3352 = vmatprep.subr.mxu1 %v4086_v0 }
  0x62   :  { %3345 = vmatprep.subr.mxu0 %v4086_v0  ;;  %3360 = vmatprep.mubr.msk.f32.mxu1 %vm4087_vm0, %v4086_v0 }
  0x63   :  { %3346 = vmatpush3.msra.mxu0 %v4247_v31 }
  0x64   :  { %3347 = vmatprep.subr.mxu0 %v4086_v0 }
  0x65   :  { %3348 = vmatpush3.msra.mxu0 %v4255_v33 }
  0x66   :  { %3363 = vmatprep.subr.mxu0 %v4086_v0 }
 0x11e   :  { %v232_v7 = vpop.f32.mrf.mxu0 }
 0x11f   :  { %v236_v8 = vadd.f32 %v232_v7, %v161_v6 }
 0x120   :  { %v3329_v9 = vpop.f32.mrf.mxu0  ;;  %v335_v38 = vpop.f32.mrf.mxu1 }
 0x121   :  { %v3110_v10 = vmul.f32 -1.442695, %v236_v8 }
 0x122   :  { %v3340_v39 = vpop.f32.mrf.mxu1 }
 0x123   :  { %3688 = vpow2.f32 %v3110_v10 }
 0x124   :  { %3690 = vtanh.f32 %v236_v8 }
 0x130   :  { %v3689_v11 = vpop.eup %3688 }
 0x131   :  { %v241_v12 = vadd.f32 1.0, %v3689_v11  ;;  %v3691_v16 = vpop.eup %3690 }
 0x133   :  { %3692 = vrcp.f32 %v241_v12 }
 0x140   :  { %v3693_v17 = vpop.eup %3692 }
 0x141   :  { %v244_v18 = vsel %vm4221_vm4, %v3691_v16, %v3693_v17  ;;  %v4314_v16 = vld [vmem:[#allocation13 + $0x18] sm:$0xff]  ;;  %v4316_v17 = vld [vmem:[#allocation13 + $0x10] sm:$0xff] }
 0x142   :  { %251 = vrot.lane.b32.xlu0 %v244_v18, %s4088_s4  ;;  %3353 = vmatpush3.msra.mxu1 %v4314_v16 }
 0x143   :  { %3354 = vmatprep.subr.mxu1 %v4086_v0 }
 0x144   :  { %3355 = vmatpush3.msra.mxu1 %v4316_v17 }
 0x145   :  { %3356 = vmatprep.subr.mxu1 %v4086_v0 }
 0x146   :  { %246 = vrot.lane.b32.xlu0 %v158_v19, %s4089_s7 }
 0x1b4   :  { %v252_v20 = vpop.permute.xlu0 %251 }
 0x1b5   :  { %v254_v21 = vmul.f32 %v252_v20, %v244_v18  ;;  %v4324_v20 = vld [vmem:[#allocation13] sm:$0xff] }
 0x1b7   :  { %256 = vrot.lane.b32.xlu1 %v254_v21, %s4089_s7 }
 0x1b8   :  { %v247_v22 = vpop.permute.xlu0 %246 }
 0x1b9   :  { %v249_v23 = vmul.f32 %v247_v22, %v244_v18 }
 0x229   :  { %v257_v24 = vpop.permute.xlu1 %256 }
 0x22a   :  { %v4230_v25 = vadd.f32 %v257_v24, %v249_v23 }
 0x22c   :  { %3694 = vtanh.f32 %v4230_v25 }
 0x239   :  { %v3695_v35 = vpop.eup %3694 }
 0x23a   :  { %262 = vrot.lane.b32.xlu1 %v3695_v35, %s4088_s4 }
 0x2ac   :  { %v263_v36 = vpop.permute.xlu1 %262 }
 0x2ad   :  { %v265_v37 = vmul.f32 %v263_v36, %v244_v18  ;;  %v4320_v18 = vld [vmem:[#allocation13 + $0x8] sm:$0xff] }
 0x2ae   :  { %3357 = vmatpush3.msra.mxu1 %v4320_v18 }
 0x2af   :  { %340 = vrot.lane.b32.xlu0 %v265_v37, %s4089_s7  ;;  %3358 = vmatprep.subr.mxu1 %v4086_v0 }
 0x2b0   :  { %3359 = vmatpush3.msra.mxu1 %v4324_v20 }
 0x2b1   :  { %3374 = vmatprep.subr.mxu1 %v4086_v0 }
 0x321   :  { %v341_v40 = vpop.permute.xlu0 %340 }
 0x322   :  { %3350 = vmatmul.mubr.msk.f32.vlgmr.msra.gmra.mxu0 %vm162_vm1, %v341_v40 }
 0x323   :  { %3364 = vmatpush3.msra.mxu0 %v4202_v1  ;;  %3371 = vmatprep.mubr.msk.f32.mxu0 %vm4087_vm0, %v4086_v0 }
 0x324   :  { %3365 = vmatprep.subr.mxu0 %v4086_v0 }
 0x325   :  { %3366 = vmatpush3.msra.mxu0 %v4204_v2 }
 0x326   :  { %3367 = vmatprep.subr.mxu0 %v4086_v0 }
 0x327   :  { %3368 = vmatpush3.msra.mxu0 %v4208_v3 }
 0x328   :  { %3369 = vmatprep.subr.mxu0 %v4086_v0 }
 0x329   :  { %3370 = vmatpush3.msra.mxu0 %v4212_v4 }
 0x32a   :  { %3372 = vmatmul.mubr.msk.f32.vlgmr.msra.gmra.mxu0 %vm162_vm1, %v341_v40  ;;  %3385 = vmatprep.subr.mxu0 %v4086_v0 }
 0x32b   :  { %3386 = vmatpush3.msra.mxu0 %v4235_v27  ;;  %3393 = vmatprep.mubr.msk.f32.mxu0 %vm4087_vm0, %v4086_v0 }
 0x32c   :  { %3387 = vmatprep.subr.mxu0 %v4086_v0 }
 0x32d   :  { %3388 = vmatpush3.msra.mxu0 %v4241_v29 }
 0x32e   :  { %3389 = vmatprep.subr.mxu0 %v4086_v0 }
 0x32f   :  { %3390 = vmatpush3.msra.mxu0 %v4247_v31 }
 0x330   :  { %3391 = vmatprep.subr.mxu0 %v4086_v0 }
 0x331   :  { %3392 = vmatpush3.msra.mxu0 %v4255_v33 }
 0x332   :  { %3407 = vmatprep.subr.mxu0 %v4086_v0 }
 0x3e2   :  { %v410_v42 = vpop.f32.mrf.mxu0 }
 0x3e3   :  { %v411_v43 = vadd.f32 %v410_v42, %v335_v38 }
 0x3e4   :  { %v3351_v44 = vpop.f32.mrf.mxu0 }
 0x3e5   :  { %v420_v45 = vadd.f32 %v4295_v41, %v411_v43 }
 0x3e7   :  { %v3114_v46 = vmul.f32 -1.442695, %v420_v45 }
 0x3e9   :  { %3696 = vpow2.f32 %v3114_v46 }
 0x3ea   :  { %v611_v48 = vpop.f32.mrf.mxu0 }
 0x3eb   :  { %v615_v49 = vadd.f32 %v611_v48, %v544_v47 }
 0x3ec   :  { %v3373_v50 = vpop.f32.mrf.mxu0 }
 0x3ed   :  { %v3118_v51 = vmul.f32 -1.442695, %v615_v49 }
 0x3ef   :  { %3698 = vpow2.f32 %v3118_v51 }
 0x3f0   :  { %3700 = vtanh.f32 %v420_v45  ;;  %v901_v45 = vld [vmem:[#allocation2 + $0x10] sm:$0xff] }
 0x3f6   :  { %v3697_v52 = vpop.eup %3696 }
 0x3f7   :  { %v425_v53 = vadd.f32 1.0, %v3697_v52 }
 0x3f9   :  { %3702 = vrcp.f32 %v425_v53 }
 0x3fa   :  { %3704 = vtanh.f32 %v615_v49 }
 0x3fc   :  { %v3699_v54 = vpop.eup %3698 }
 0x3fd   :  { %v620_v55 = vadd.f32 1.0, %v3699_v54  ;;  %v3701_v56 = vpop.eup %3700 }
 0x3ff   :  { %3706 = vrcp.f32 %v620_v55 }
 0x406   :  { %v3703_v57 = vpop.eup %3702 }
 0x407   :  { %v428_v58 = vsel %vm4221_vm4, %v3701_v56, %v3703_v57  ;;  %v3705_v60 = vpop.eup %3704 }
 0x408   :  { %435 = vrot.lane.b32.xlu1 %v428_v58, %s4088_s4 }
 0x40c   :  { %v3707_v61 = vpop.eup %3706  ;;  %430 = vrot.lane.b32.xlu1 %v160_v59, %s4089_s7 }
 0x40d   :  { %v623_v62 = vsel %vm4221_vm4, %v3705_v60, %v3707_v61 }
 0x40e   :  { %626 = vrot.lane.b32.xlu0 %v623_v62, %s4088_s4  ;;  %v624_v12 = vmul.f32 %v623_v62, %v4230_v25 }
 0x47a   :  { %v436_v63 = vpop.permute.xlu1 %435 }
 0x47b   :  { %v438_v5 = vmul.f32 %v436_v63, %v428_v58 }
 0x47d   :  { %440 = vrot.lane.b32.xlu0 %v438_v5, %s4089_s7 }
 0x47e   :  { %v431_v8 = vpop.permute.xlu1 %430 }
 0x47f   :  { %v433_v9 = vmul.f32 %v431_v8, %v428_v58 }
 0x480   :  { %v627_v6 = vpop.permute.xlu0 %626 }
 0x481   :  { %v629_v7 = vmul.f32 %v627_v6, %v623_v62 }
 0x483   :  { %631 = vrot.lane.b32.xlu1 %v629_v7, %s4089_s7 }
 0x4ef   :  { %v441_v10 = vpop.permute.xlu0 %440 }
 0x4f0   :  { %v4307_v11 = vadd.f32 %v441_v10, %v433_v9 }
 0x4f2   :  { %3708 = vtanh.f32 %v4307_v11 }
 0x4f5   :  { %v632_v13 = vpop.permute.xlu1 %631 }
 0x4f6   :  { %v4311_v14 = vadd.f32 %v632_v13, %v624_v12 }
 0x4f8   :  { %3710 = vtanh.f32 %v4311_v14 }
 0x4ff   :  { %v3709_v19 = vpop.eup %3708 }
 0x500   :  { %446 = vrot.lane.b32.xlu0 %v3709_v19, %s4088_s4 }
 0x505   :  { %v3711_v21 = vpop.eup %3710 }
 0x506   :  { %637 = vrot.lane.b32.xlu1 %v3711_v21, %s4088_s4 }
 0x572   :  { %v447_v22 = vpop.permute.xlu0 %446 }
 0x573   :  { %v449_v23 = vmul.f32 %v447_v22, %v428_v58 }
 0x575   :  { %457 = vrot.lane.b32.xlu0 %v449_v23, %s4089_s7 }
 0x578   :  { %v638_v24 = vpop.permute.xlu1 %637 }
 0x579   :  { %v640_v25 = vmul.f32 %v638_v24, %v623_v62 }
 0x57b   :  { %712 = vrot.lane.b32.xlu1 %v640_v25, %s4089_s7 }
 0x5e7   :  { %v458_v34 = vpop.permute.xlu0 %457 }
 0x5e8   :  { %3361 = vmatmul.mubr.msk.f32.vlgmr.msra.gmra.mxu1 %vm162_vm1, %v458_v34 }
 0x5e9   :  { %3375 = vmatpush3.msra.mxu1 %v4233_v26  ;;  %3382 = vmatprep.mubr.msk.f32.mxu1 %vm4087_vm0, %v4086_v0 }
 0x5ea   :  { %3376 = vmatprep.subr.mxu1 %v4086_v0 }
 0x5eb   :  { %3377 = vmatpush3.msra.mxu1 %v4237_v28 }
 0x5ec   :  { %3378 = vmatprep.subr.mxu1 %v4086_v0 }
 0x5ed   :  { %3379 = vmatpush3.msra.mxu1 %v4245_v30  ;;  %v713_v35 = vpop.permute.xlu1 %712 }
 0x5ee   :  { %3380 = vmatprep.subr.mxu1 %v4086_v0  ;;  %3394 = vmatmul.mubr.msk.f32.vlgmr.msra.gmra.mxu0 %vm162_vm1, %v713_v35 }
 0x5ef   :  { %3408 = vmatpush3.msra.mxu0 %v4202_v1  ;;  %3381 = vmatpush3.msra.mxu1 %v4253_v32 }
 0x5f0   :  { %3409 = vmatprep.subr.mxu0 %v4086_v0  ;;  %3383 = vmatmul.mubr.msk.f32.vlgmr.msra.gmra.mxu1 %vm162_vm1, %v458_v34 }
 0x5f1   :  { %3410 = vmatpush3.msra.mxu0 %v4204_v2  ;;  %3415 = vmatprep.mubr.msk.f32.mxu0 %vm4087_vm0, %v4086_v0 }
 0x5f2   :  { %3411 = vmatprep.subr.mxu0 %v4086_v0  ;;  %3396 = vmatprep.subr.mxu1 %v4086_v0 }
 0x5f3   :  { %3412 = vmatpush3.msra.mxu0 %v4208_v3  ;;  %3397 = vmatpush3.msra.mxu1 %v4314_v16 }
 0x5f4   :  { %3413 = vmatprep.subr.mxu0 %v4086_v0  ;;  %3398 = vmatprep.subr.mxu1 %v4086_v0 }
 0x5f5   :  { %3414 = vmatpush3.msra.mxu0 %v4212_v4  ;;  %3399 = vmatpush3.msra.mxu1 %v4316_v17 }
 0x5f6   :  { %3416 = vmatmul.mubr.msk.f32.vlgmr.msra.gmra.mxu0 %vm162_vm1, %v713_v35  ;;  %3429 = vmatprep.subr.mxu0 %v4086_v0 }
 0x5f7   :  { %3400 = vmatprep.subr.mxu1 %v4086_v0  ;;  %3430 = vmatpush3.msra.mxu0 %v4235_v27 }
 0x5f8   :  { %3401 = vmatpush3.msra.mxu1 %v4320_v18  ;;  %3431 = vmatprep.subr.mxu0 %v4086_v0 }
 0x5f9   :  { %3402 = vmatprep.subr.mxu1 %v4086_v0  ;;  %3432 = vmatpush3.msra.mxu0 %v4241_v29 }
 0x5fa   :  { %3403 = vmatpush3.msra.mxu1 %v4324_v20  ;;  %3433 = vmatprep.subr.mxu0 %v4086_v0 }
 0x5fb   :  { %3404 = vmatprep.mubr.msk.f32.mxu1 %vm4087_vm0, %v4086_v0  ;;  %3418 = vmatprep.subr.mxu1 %v4086_v0 }
 0x5fc   :  { %3434 = vmatpush3.msra.mxu0 %v4247_v31  ;;  %3437 = vmatprep.mubr.msk.f32.mxu0 %vm4087_vm0, %v4086_v0 }
 0x5fd   :  { %3435 = vmatprep.subr.mxu0 %v4086_v0 }
 0x5fe   :  { %3436 = vmatpush3.msra.mxu0 %v4255_v33 }
 0x5ff   :  { %3451 = vmatprep.subr.mxu0 %v4086_v0 }
 0x6a8   :  { %v4378_v36 = vpop.f32.mrf.mxu1 }
 0x6aa   :  { %v3362_v37 = vpop.f32.mrf.mxu1 }
 0x6ae   :  { %v782_v38 = vpop.f32.mrf.mxu0 }
 0x6b0   :  { %v707_v39 = vpop.f32.mrf.mxu1  ;;  %v3395_v40 = vpop.f32.mrf.mxu0 }
 0x6b1   :  { %v783_v42 = vadd.f32 %v782_v38, %v707_v39 }
 0x6b2   :  { %v3384_v43 = vpop.f32.mrf.mxu1 }
 0x6b3   :  { %v786_v44 = vadd.f32 %v4295_v41, %v783_v42  ;;  %v1258_v42 = vld [vmem:[#allocation2 + $0x18] sm:$0xff] }
 0x6b5   :  { %v3121_v46 = vmul.f32 -1.442695, %v786_v44 }
 0x6b6   :  { %v968_v47 = vpop.f32.mrf.mxu0 }
 0x6b7   :  { %3712 = vpow2.f32 %v3121_v46  ;;  %v972_v48 = vadd.f32 %v968_v47, %v901_v45 }
 0x6b8   :  { %v3417_v49 = vpop.f32.mrf.mxu0 }
 0x6b9   :  { %v3124_v50 = vmul.f32 -1.442695, %v972_v48 }
 0x6bb   :  { %3714 = vpow2.f32 %v3124_v50 }
 0x6bc   :  { %3716 = vtanh.f32 %v786_v44 }
 0x6c4   :  { %v3713_v51 = vpop.eup %3712 }
 0x6c5   :  { %v791_v52 = vadd.f32 1.0, %v3713_v51 }
 0x6c7   :  { %3718 = vrcp.f32 %v791_v52 }
 0x6c8   :  { %v3715_v53 = vpop.eup %3714  ;;  %3720 = vtanh.f32 %v972_v48 }
 0x6c9   :  { %v977_v54 = vadd.f32 1.0, %v3715_v53  ;;  %v3717_v55 = vpop.eup %3716 }
 0x6cb   :  { %3722 = vrcp.f32 %v977_v54 }
 0x6d4   :  { %v3719_v56 = vpop.eup %3718 }
 0x6d5   :  { %v794_v57 = vsel %vm4221_vm4, %v3717_v55, %v3719_v56  ;;  %v3721_v58 = vpop.eup %3720 }
 0x6d6   :  { %797 = vrot.lane.b32.xlu0 %v794_v57, %s4088_s4  ;;  %v795_v6 = vmul.f32 %v794_v57, %v4307_v11 }
 0x6d8   :  { %v3723_v59 = vpop.eup %3722 }
 0x6d9   :  { %v980_v60 = vsel %vm4221_vm4, %v3721_v58, %v3723_v59 }
 0x6da   :  { %983 = vrot.lane.b32.xlu1 %v980_v60, %s4088_s4  ;;  %v981_v9 = vmul.f32 %v980_v60, %v4311_v14 }
 0x748   :  { %v798_v61 = vpop.permute.xlu0 %797 }
 0x749   :  { %v800_v62 = vmul.f32 %v798_v61, %v794_v57 }
 0x74b   :  { %802 = vrot.lane.b32.xlu0 %v800_v62, %s4089_s7 }
 0x74c   :  { %v984_v63 = vpop.permute.xlu1 %983 }
 0x74d   :  { %v986_v5 = vmul.f32 %v984_v63, %v980_v60 }
 0x74f   :  { %988 = vrot.lane.b32.xlu1 %v986_v5, %s4089_s7 }
 0x7bd   :  { %v803_v7 = vpop.permute.xlu0 %802 }
 0x7be   :  { %v4390_v8 = vadd.f32 %v803_v7, %v795_v6 }
 0x7c0   :  { %3724 = vtanh.f32 %v4390_v8 }
 0x7c1   :  { %v989_v10 = vpop.permute.xlu1 %988 }
 0x7c2   :  { %v4394_v12 = vadd.f32 %v989_v10, %v981_v9 }
 0x7c4   :  { %3726 = vtanh.f32 %v4394_v12 }
 0x7cd   :  { %v3725_v13 = vpop.eup %3724 }
 0x7ce   :  { %808 = vrot.lane.b32.xlu0 %v3725_v13, %s4088_s4 }
 0x7d1   :  { %v3727_v19 = vpop.eup %3726 }
 0x7d2   :  { %994 = vrot.lane.b32.xlu1 %v3727_v19, %s4088_s4 }
 0x840   :  { %v809_v21 = vpop.permute.xlu0 %808 }
 0x841   :  { %v811_v11 = vmul.f32 %v809_v21, %v794_v57 }
 0x843   :  { %813 = vrot.lane.b32.xlu0 %v811_v11, %s4089_s7 }
 0x844   :  { %v995_v22 = vpop.permute.xlu1 %994 }
 0x845   :  { %v997_v23 = vmul.f32 %v995_v22, %v980_v60 }
 0x847   :  { %1069 = vrot.lane.b32.xlu1 %v997_v23, %s4089_s7 }
 0x8b5   :  { %v814_v14 = vpop.permute.xlu0 %813 }
 0x8b6   :  { %3405 = vmatmul.mubr.msk.f32.vlgmr.msra.gmra.mxu1 %vm162_vm1, %v814_v14 }
 0x8b7   :  { %3419 = vmatpush3.msra.mxu1 %v4233_v26  ;;  %3426 = vmatprep.mubr.msk.f32.mxu1 %vm4087_vm0, %v4086_v0 }
 0x8b8   :  { %3420 = vmatprep.subr.mxu1 %v4086_v0 }
 0x8b9   :  { %3421 = vmatpush3.msra.mxu1 %v4237_v28  ;;  %v1070_v24 = vpop.permute.xlu1 %1069 }
 0x8ba   :  { %3422 = vmatprep.subr.mxu1 %v4086_v0  ;;  %3438 = vmatmul.mubr.msk.f32.vlgmr.msra.gmra.mxu0 %vm162_vm1, %v1070_v24 }
 0x8bb   :  { %3452 = vmatpush3.msra.mxu0 %v4202_v1  ;;  %3423 = vmatpush3.msra.mxu1 %v4245_v30 }
 0x8bc   :  { %3453 = vmatprep.subr.mxu0 %v4086_v0  ;;  %3424 = vmatprep.subr.mxu1 %v4086_v0 }
 0x8bd   :  { %3454 = vmatpush3.msra.mxu0 %v4204_v2  ;;  %3425 = vmatpush3.msra.mxu1 %v4253_v32 }
 0x8be   :  { %3455 = vmatprep.subr.mxu0 %v4086_v0  ;;  %3427 = vmatmul.mubr.msk.f32.vlgmr.msra.gmra.mxu1 %vm162_vm1, %v814_v14 }
 0x8bf   :  { %3456 = vmatpush3.msra.mxu0 %v4208_v3  ;;  %3459 = vmatprep.mubr.msk.f32.mxu0 %vm4087_vm0, %v4086_v0 }
 0x8c0   :  { %3457 = vmatprep.subr.mxu0 %v4086_v0  ;;  %3440 = vmatprep.subr.mxu1 %v4086_v0 }
 0x8c1   :  { %3458 = vmatpush3.msra.mxu0 %v4212_v4  ;;  %3441 = vmatpush3.msra.mxu1 %v4314_v16 }
 0x8c2   :  { %3460 = vmatmul.mubr.msk.f32.vlgmr.msra.gmra.mxu0 %vm162_vm1, %v1070_v24  ;;  %3473 = vmatprep.subr.mxu0 %v4086_v0 }
 0x8c3   :  { %3442 = vmatprep.subr.mxu1 %v4086_v0  ;;  %3474 = vmatpush3.msra.mxu0 %v4235_v27 }
 0x8c4   :  { %3443 = vmatpush3.msra.mxu1 %v4316_v17  ;;  %3475 = vmatprep.subr.mxu0 %v4086_v0 }
 0x8c5   :  { %3444 = vmatprep.subr.mxu1 %v4086_v0  ;;  %3476 = vmatpush3.msra.mxu0 %v4241_v29 }
 0x8c6   :  { %3445 = vmatpush3.msra.mxu1 %v4320_v18  ;;  %3477 = vmatprep.subr.mxu0 %v4086_v0 }
 0x8c7   :  { %3446 = vmatprep.subr.mxu1 %v4086_v0  ;;  %3478 = vmatpush3.msra.mxu0 %v4247_v31 }
 0x8c8   :  { %3447 = vmatpush3.msra.mxu1 %v4324_v20  ;;  %3479 = vmatprep.subr.mxu0 %v4086_v0 }
 0x8c9   :  { %3448 = vmatprep.mubr.msk.f32.mxu1 %vm4087_vm0, %v4086_v0  ;;  %3462 = vmatprep.subr.mxu1 %v4086_v0 }
 0x8ca   :  { %3480 = vmatpush3.msra.mxu0 %v4255_v33  ;;  %3481 = vmatprep.mubr.msk.f32.mxu0 %vm4087_vm0, %v4086_v0 }
 0x8cb   :  { %3495 = vmatprep.subr.mxu0 %v4086_v0 }
 0x976   :  { %v4445_v25 = vpop.f32.mrf.mxu1 }
 0x978   :  { %v3406_v34 = vpop.f32.mrf.mxu1 }
 0x97a   :  { %v1139_v35 = vpop.f32.mrf.mxu0 }
 0x97c   :  { %v3439_v37 = vpop.f32.mrf.mxu0 }
 0x97e   :  { %v1064_v38 = vpop.f32.mrf.mxu1 }
 0x97f   :  { %v1140_v39 = vadd.f32 %v1139_v35, %v1064_v38  ;;  %v1615_v38 = vld [vmem:[#allocation2 + $0x20] sm:$0xff] }
 0x980   :  { %v3428_v40 = vpop.f32.mrf.mxu1 }
 0x981   :  { %v1143_v43 = vadd.f32 %v4295_v41, %v1140_v39 }
 0x982   :  { %v1325_v44 = vpop.f32.mrf.mxu0 }
 0x983   :  { %v3127_v45 = vmul.f32 -1.442695, %v1143_v43  ;;  %v1329_v46 = vadd.f32 %v1325_v44, %v1258_v42 }
 0x984   :  { %v3461_v47 = vpop.f32.mrf.mxu0 }
 0x985   :  { %3728 = vpow2.f32 %v3127_v45  ;;  %v3130_v48 = vmul.f32 -1.442695, %v1329_v46 }
 0x987   :  { %3730 = vpow2.f32 %v3130_v48 }
 0x988   :  { %3732 = vtanh.f32 %v1143_v43 }
 0x992   :  { %v3729_v49 = vpop.eup %3728 }
 0x993   :  { %v1148_v50 = vadd.f32 1.0, %v3729_v49 }
 0x994   :  { %v3731_v51 = vpop.eup %3730 }
 0x995   :  { %3734 = vrcp.f32 %v1148_v50  ;;  %v1334_v52 = vadd.f32 1.0, %v3731_v51  ;;  %v3733_v53 = vpop.eup %3732 }
 0x996   :  { %3736 = vtanh.f32 %v1329_v46 }
 0x997   :  { %3738 = vrcp.f32 %v1334_v52 }
 0x9a2   :  { %v3735_v54 = vpop.eup %3734 }
 0x9a3   :  { %v3737_v55 = vpop.eup %3736  ;;  %v1151_v56 = vsel %vm4221_vm4, %v3733_v53, %v3735_v54 }
 0x9a4   :  { %v3739_v57 = vpop.eup %3738  ;;  %1154 = vrot.lane.b32.xlu0 %v1151_v56, %s4088_s4  ;;  %v1152_v63 = vmul.f32 %v1151_v56, %v4390_v8 }
 0x9a5   :  { %v1337_v58 = vsel %vm4221_vm4, %v3737_v55, %v3739_v57 }
 0x9a6   :  { %1340 = vrot.lane.b32.xlu1 %v1337_v58, %s4088_s4  ;;  %v1338_v7 = vmul.f32 %v1337_v58, %v4394_v12 }
 0xa16   :  { %v1155_v59 = vpop.permute.xlu0 %1154 }
 0xa17   :  { %v1157_v60 = vmul.f32 %v1155_v59, %v1151_v56 }
 0xa18   :  { %v1341_v61 = vpop.permute.xlu1 %1340 }
 0xa19   :  { %v1343_v62 = vmul.f32 %v1341_v61, %v1337_v58  ;;  %1159 = vrot.lane.b32.xlu0 %v1157_v60, %s4089_s7 }
 0xa1b   :  { %1345 = vrot.lane.b32.xlu1 %v1343_v62, %s4089_s7 }
 0xa8b   :  { %v1160_v5 = vpop.permute.xlu0 %1159 }
 0xa8c   :  { %v4457_v6 = vadd.f32 %v1160_v5, %v1152_v63 }
 0xa8d   :  { %v1346_v9 = vpop.permute.xlu1 %1345 }
 0xa8e   :  { %3740 = vtanh.f32 %v4457_v6  ;;  %v4461_v10 = vadd.f32 %v1346_v9, %v1338_v7 }
 0xa90   :  { %3742 = vtanh.f32 %v4461_v10 }
 0xa9b   :  { %v3741_v13 = vpop.eup %3740 }
 0xa9c   :  { %1165 = vrot.lane.b32.xlu0 %v3741_v13, %s4088_s4 }
 0xa9d   :  { %v3743_v19 = vpop.eup %3742 }
 0xa9e   :  { %1351 = vrot.lane.b32.xlu1 %v3743_v19, %s4088_s4 }
 0xb0e   :  { %v1166_v21 = vpop.permute.xlu0 %1165 }
 0xb0f   :  { %v1168_v8 = vmul.f32 %v1166_v21, %v1151_v56 }
 0xb10   :  { %v1352_v11 = vpop.permute.xlu1 %1351 }
 0xb11   :  { %v1354_v22 = vmul.f32 %v1352_v11, %v1337_v58  ;;  %1170 = vrot.lane.b32.xlu0 %v1168_v8, %s4089_s7 }
 0xb13   :  { %1426 = vrot.lane.b32.xlu1 %v1354_v22, %s4089_s7 }
 0xb83   :  { %v1171_v12 = vpop.permute.xlu0 %1170 }
 0xb84   :  { %3449 = vmatmul.mubr.msk.f32.vlgmr.msra.gmra.mxu1 %vm162_vm1, %v1171_v12 }
 0xb85   :  { %3463 = vmatpush3.msra.mxu1 %v4233_v26  ;;  %v1427_v23 = vpop.permute.xlu1 %1426  ;;  %3470 = vmatprep.mubr.msk.f32.mxu1 %vm4087_vm0, %v4086_v0 }
 0xb86   :  { %3464 = vmatprep.subr.mxu1 %v4086_v0  ;;  %3482 = vmatmul.mubr.msk.f32.vlgmr.msra.gmra.mxu0 %vm162_vm1, %v1427_v23 }
 0xb87   :  { %3496 = vmatpush3.msra.mxu0 %v4202_v1  ;;  %3465 = vmatpush3.msra.mxu1 %v4237_v28 }
 0xb88   :  { %3497 = vmatprep.subr.mxu0 %v4086_v0  ;;  %3466 = vmatprep.subr.mxu1 %v4086_v0 }
 0xb89   :  { %3498 = vmatpush3.msra.mxu0 %v4204_v2  ;;  %3467 = vmatpush3.msra.mxu1 %v4245_v30 }
 0xb8a   :  { %3499 = vmatprep.subr.mxu0 %v4086_v0  ;;  %3468 = vmatprep.subr.mxu1 %v4086_v0 }
 0xb8b   :  { %3500 = vmatpush3.msra.mxu0 %v4208_v3  ;;  %3469 = vmatpush3.msra.mxu1 %v4253_v32 }
 0xb8c   :  { %3501 = vmatprep.subr.mxu0 %v4086_v0  ;;  %3471 = vmatmul.mubr.msk.f32.vlgmr.msra.gmra.mxu1 %vm162_vm1, %v1171_v12 }
 0xb8d   :  { %3502 = vmatpush3.msra.mxu0 %v4212_v4  ;;  %3503 = vmatprep.mubr.msk.f32.mxu0 %vm4087_vm0, %v4086_v0 }
 0xb8e   :  { %3504 = vmatmul.mubr.msk.f32.vlgmr.msra.gmra.mxu0 %vm162_vm1, %v1427_v23  ;;  %3517 = vmatprep.subr.mxu0 %v4086_v0 }
 0xb8f   :  { %3484 = vmatprep.subr.mxu1 %v4086_v0  ;;  %3518 = vmatpush3.msra.mxu0 %v4235_v27 }
 0xb90   :  { %3485 = vmatpush3.msra.mxu1 %v4314_v16  ;;  %3519 = vmatprep.subr.mxu0 %v4086_v0 }
 0xb91   :  { %3486 = vmatprep.subr.mxu1 %v4086_v0  ;;  %3520 = vmatpush3.msra.mxu0 %v4241_v29 }
 0xb92   :  { %3487 = vmatpush3.msra.mxu1 %v4316_v17  ;;  %3521 = vmatprep.subr.mxu0 %v4086_v0 }
 0xb93   :  { %3488 = vmatprep.subr.mxu1 %v4086_v0  ;;  %3522 = vmatpush3.msra.mxu0 %v4247_v31 }
 0xb94   :  { %3489 = vmatpush3.msra.mxu1 %v4320_v18  ;;  %3523 = vmatprep.subr.mxu0 %v4086_v0 }
 0xb95   :  { %3490 = vmatprep.subr.mxu1 %v4086_v0  ;;  %3524 = vmatpush3.msra.mxu0 %v4255_v33 }
 0xb96   :  { %3491 = vmatpush3.msra.mxu1 %v4324_v20  ;;  %3525 = vmatprep.mubr.msk.f32.mxu0 %vm4087_vm0, %v4086_v0 }
 0xb97   :  { %3539 = vmatprep.subr.mxu0 %v4086_v0  ;;  %3492 = vmatprep.mubr.msk.f32.mxu1 %vm4087_vm0, %v4086_v0 }
 0xb98   :  { %3506 = vmatprep.subr.mxu1 %v4086_v0 }
 0xc44   :  { %v4512_v14 = vpop.f32.mrf.mxu1 }
 0xc46   :  { %v1496_v24 = vpop.f32.mrf.mxu0  ;;  %v3450_v34 = vpop.f32.mrf.mxu1 }
 0xc48   :  { %v3483_v35 = vpop.f32.mrf.mxu0 }
 0xc4c   :  { %v1421_v37 = vpop.f32.mrf.mxu1 }
 0xc4d   :  { %v1497_v39 = vadd.f32 %v1496_v24, %v1421_v37 }
 0xc4e   :  { %v1682_v40 = vpop.f32.mrf.mxu0  ;;  %v3472_v42 = vpop.f32.mrf.mxu1 }
 0xc4f   :  { %v1500_v43 = vadd.f32 %v4295_v41, %v1497_v39  ;;  %v1686_v44 = vadd.f32 %v1682_v40, %v1615_v38 }
 0xc50   :  { %v3505_v45 = vpop.f32.mrf.mxu0 }
 0xc51   :  { %v3133_v46 = vmul.f32 -1.442695, %v1500_v43  ;;  %v3136_v47 = vmul.f32 -1.442695, %v1686_v44 }
 0xc53   :  { %3744 = vpow2.f32 %v3133_v46 }
 0xc54   :  { %3746 = vpow2.f32 %v3136_v47 }
 0xc55   :  { %3748 = vtanh.f32 %v1500_v43 }
 0xc56   :  { %3750 = vtanh.f32 %v1686_v44 }
 0xc60   :  { %v3745_v48 = vpop.eup %3744 }
 0xc61   :  { %v3747_v49 = vpop.eup %3746  ;;  %v1505_v50 = vadd.f32 1.0, %v3745_v48 }
 0xc62   :  { %v1691_v51 = vadd.f32 1.0, %v3747_v49  ;;  %v3749_v52 = vpop.eup %3748 }
 0xc63   :  { %3752 = vrcp.f32 %v1505_v50  ;;  %v3751_v53 = vpop.eup %3750 }
 0xc64   :  { %3754 = vrcp.f32 %v1691_v51 }
 0xc70   :  { %v3753_v54 = vpop.eup %3752 }
 0xc71   :  { %v3755_v55 = vpop.eup %3754  ;;  %v1508_v56 = vsel %vm4221_vm4, %v3749_v52, %v3753_v54 }
 0xc72   :  { %v1694_v57 = vsel %vm4221_vm4, %v3751_v53, %v3755_v55  ;;  %1511 = vrot.lane.b32.xlu0 %v1508_v56, %s4088_s4  ;;  %v1509_v62 = vmul.f32 %v1508_v56, %v4457_v6 }
 0xc73   :  { %1697 = vrot.lane.b32.xlu1 %v1694_v57, %s4088_s4  ;;  %v1695_v63 = vmul.f32 %v1694_v57, %v4461_v10 }
 0xce4   :  { %v1512_v58 = vpop.permute.xlu0 %1511 }
 0xce5   :  { %v1698_v59 = vpop.permute.xlu1 %1697  ;;  %v1514_v60 = vmul.f32 %v1512_v58, %v1508_v56 }
 0xce6   :  { %v1700_v61 = vmul.f32 %v1698_v59, %v1694_v57 }
 0xce7   :  { %1516 = vrot.lane.b32.xlu0 %v1514_v60, %s4089_s7 }
 0xce8   :  { %1702 = vrot.lane.b32.xlu1 %v1700_v61, %s4089_s7 }
 0xd59   :  { %v1517_v5 = vpop.permute.xlu0 %1516 }
 0xd5a   :  { %v1703_v7 = vpop.permute.xlu1 %1702  ;;  %v4525_v9 = vadd.f32 %v1517_v5, %v1509_v62  ;;  %v4603_v62 = vld [vmem:[#allocation8 + $0x18] sm:$0xff]  ;;  %v4609_v5 = vld [vmem:[#allocation8 + $0x10] sm:$0xff] }
 0xd5b   :  { %v4527_v13 = vadd.f32 %v1703_v7, %v1695_v63  ;;  %v4613_v7 = vld [vmem:[#allocation11 + $0x18] sm:$0xff] }
 0xd5c   :  { %3756 = vtanh.f32 %v4525_v9 }
 0xd5d   :  { %3758 = vtanh.f32 %v4527_v13 }
 0xd69   :  { %v3757_v19 = vpop.eup %3756 }
 0xd6a   :  { %v3759_v21 = vpop.eup %3758  ;;  %1522 = vrot.lane.b32.xlu0 %v3757_v19, %s4088_s4  ;;  %v4626_v19 = vld [vmem:[#allocation8] sm:$0xff] }
 0xd6b   :  { %1708 = vrot.lane.b32.xlu1 %v3759_v21, %s4088_s4  ;;  %v4629_v21 = vld [vmem:[#allocation11 + $0x8] sm:$0xff] }
 0xddc   :  { %v1523_v8 = vpop.permute.xlu0 %1522 }
 0xddd   :  { %v1709_v6 = vpop.permute.xlu1 %1708  ;;  %v1525_v11 = vmul.f32 %v1523_v8, %v1508_v56  ;;  %v4636_v8 = vld [vmem:[#allocation11] sm:$0xff] }
 0xdde   :  { %v1711_v10 = vmul.f32 %v1709_v6, %v1694_v57  ;;  %v4641_v6 = vld [vmem:[#allocation10 + $0x18] sm:$0xff] }
 0xddf   :  { %1527 = vrot.lane.b32.xlu0 %v1525_v11, %s4089_s7  ;;  %v4646_v11 = vld [vmem:[#allocation10 + $0x10] sm:$0xff] }
 0xde0   :  { %1783 = vrot.lane.b32.xlu1 %v1711_v10, %s4089_s7  ;;  %v4652_v10 = vld [vmem:[#allocation10 + $0x8] sm:$0xff] }
 0xe51   :  { %v1528_v22 = vpop.permute.xlu0 %1527 }
 0xe52   :  { %v1784_v12 = vpop.permute.xlu1 %1783  ;;  %3493 = vmatmul.mubr.msk.f32.vlgmr.msra.gmra.mxu1 %vm162_vm1, %v1528_v22 }
 0xe53   :  { %3526 = vmatmul.mubr.msk.f32.vlgmr.msra.gmra.mxu0 %vm162_vm1, %v1784_v12  ;;  %3507 = vmatpush3.msra.mxu1 %v4233_v26  ;;  %v1972_v26 = vld [vmem:[#allocation2 + $0x28] sm:$0xff] }
 0xe54   :  { %3540 = vmatpush3.msra.mxu0 %v4202_v1  ;;  %3508 = vmatprep.subr.mxu1 %v4086_v0 }
 0xe55   :  { %3541 = vmatprep.subr.mxu0 %v4086_v0  ;;  %3509 = vmatpush3.msra.mxu1 %v4237_v28 }
 0xe56   :  { %3542 = vmatpush3.msra.mxu0 %v4204_v2  ;;  %3510 = vmatprep.subr.mxu1 %v4086_v0 }
 0xe57   :  { %3543 = vmatprep.subr.mxu0 %v4086_v0  ;;  %3511 = vmatpush3.msra.mxu1 %v4245_v30 }
 0xe58   :  { %3544 = vmatpush3.msra.mxu0 %v4208_v3  ;;  %3512 = vmatprep.subr.mxu1 %v4086_v0 }
 0xe59   :  { %3545 = vmatprep.subr.mxu0 %v4086_v0  ;;  %3547 = vmatprep.mubr.msk.f32.mxu0 %vm4087_vm0, %v4086_v0 }
 0xe5a   :  { %3546 = vmatpush3.msra.mxu0 %v4212_v4  ;;  %3513 = vmatpush3.msra.mxu1 %v4253_v32 }
 0xe5b   :  { %3514 = vmatprep.mubr.msk.f32.mxu1 %vm4087_vm0, %v4086_v0  ;;  %3548 = vmatmul.mubr.msk.f32.vlgmr.msra.gmra.mxu0 %vm162_vm1, %v1784_v12 }
 0xe5c   :  { %3515 = vmatmul.mubr.msk.f32.vlgmr.msra.gmra.mxu1 %vm162_vm1, %v1528_v22  ;;  %3561 = vmatprep.subr.mxu0 %v4086_v0  ;;  %v4659_v22 = vld [vmem:[#allocation10] sm:$0xff] }
 0xe5d   :  { %3562 = vmatpush3.msra.mxu0 %v4235_v27  ;;  %3528 = vmatprep.subr.mxu1 %v4086_v0 }
 0xe5e   :  { %3563 = vmatprep.subr.mxu0 %v4086_v0  ;;  %3529 = vmatpush3.msra.mxu1 %v4314_v16 }
 0xe5f   :  { %3564 = vmatpush3.msra.mxu0 %v4241_v29  ;;  %3530 = vmatprep.subr.mxu1 %v4086_v0 }
 0xe60   :  { %3565 = vmatprep.subr.mxu0 %v4086_v0  ;;  %3531 = vmatpush3.msra.mxu1 %v4316_v17 }
 0xe61   :  { %3566 = vmatpush3.msra.mxu0 %v4247_v31  ;;  %3532 = vmatprep.subr.mxu1 %v4086_v0 }
 0xe62   :  { %3567 = vmatprep.subr.mxu0 %v4086_v0  ;;  %3533 = vmatpush3.msra.mxu1 %v4320_v18 }
 0xe63   :  { %3568 = vmatpush3.msra.mxu0 %v4255_v33  ;;  %3569 = vmatprep.mubr.msk.f32.mxu0 %vm4087_vm0, %v4086_v0 }
 0xe64   :  { %3583 = vmatprep.subr.mxu0 %v4086_v0  ;;  %3534 = vmatprep.subr.mxu1 %v4086_v0 }
 0xe65   :  { %3535 = vmatpush3.msra.mxu1 %v4324_v20  ;;  %3536 = vmatprep.mubr.msk.f32.mxu1 %vm4087_vm0, %v4086_v0 }
 0xe66   :  { %3550 = vmatprep.subr.mxu1 %v4086_v0 }
 0xf12   :  { %v4579_v1 = vpop.f32.mrf.mxu1 }
 0xf13   :  { %v1853_v2 = vpop.f32.mrf.mxu0 }
 0xf14   :  { %v3494_v3 = vpop.f32.mrf.mxu1 }
 0xf15   :  { %v3527_v4 = vpop.f32.mrf.mxu0  ;;  %v2329_v3 = vld [vmem:[#allocation2 + $0x30] sm:$0xff] }
 0xf1b   :  { %v2039_v27 = vpop.f32.mrf.mxu0 }
 0xf1c   :  { %v2043_v28 = vadd.f32 %v2039_v27, %v1972_v26  ;;  %v1778_v29 = vpop.f32.mrf.mxu1 }
 0xf1d   :  { %v1854_v30 = vadd.f32 %v1853_v2, %v1778_v29  ;;  %v3549_v31 = vpop.f32.mrf.mxu0 }
 0xf1e   :  { %v3142_v32 = vmul.f32 -1.442695, %v2043_v28  ;;  %v3516_v33 = vpop.f32.mrf.mxu1 }
 0xf1f   :  { %v1857_v23 = vadd.f32 %v4295_v41, %v1854_v30 }
 0xf20   :  { %3760 = vpow2.f32 %v3142_v32 }
 0xf21   :  { %v3139_v24 = vmul.f32 -1.442695, %v1857_v23 }
 0xf23   :  { %3762 = vpow2.f32 %v3139_v24 }
 0xf24   :  { %3764 = vtanh.f32 %v2043_v28 }
 0xf2d   :  { %v3761_v34 = vpop.eup %3760 }
 0xf2e   :  { %v2048_v35 = vadd.f32 1.0, %v3761_v34 }
 0xf30   :  { %v3763_v37 = vpop.eup %3762  ;;  %3766 = vrcp.f32 %v2048_v35 }
 0xf31   :  { %v1862_v38 = vadd.f32 1.0, %v3763_v37  ;;  %3768 = vtanh.f32 %v1857_v23  ;;  %v3765_v39 = vpop.eup %3764 }
 0xf33   :  { %3770 = vrcp.f32 %v1862_v38 }
 0xf3d   :  { %v3767_v40 = vpop.eup %3766 }
 0xf3e   :  { %v2051_v42 = vsel %vm4221_vm4, %v3765_v39, %v3767_v40  ;;  %v3769_v43 = vpop.eup %3768 }
 0xf3f   :  { %2054 = vrot.lane.b32.xlu1 %v2051_v42, %s4088_s4  ;;  %v2052_v49 = vmul.f32 %v2051_v42, %v4527_v13  ;;  %v4621_v13 = vld [vmem:[#allocation11 + $0x10] sm:$0xff] }
 0xf40   :  { %v3771_v41 = vpop.eup %3770 }
 0xf41   :  { %v1865_v44 = vsel %vm4221_vm4, %v3769_v43, %v3771_v41 }
 0xf42   :  { %1868 = vrot.lane.b32.xlu0 %v1865_v44, %s4088_s4  ;;  %v1866_v52 = vmul.f32 %v1865_v44, %v4525_v9  ;;  %v4618_v9 = vld [vmem:[#allocation8 + $0x8] sm:$0xff] }
 0xfb1   :  { %v2055_v45 = vpop.permute.xlu1 %2054 }
 0xfb2   :  { %v2057_v46 = vmul.f32 %v2055_v45, %v2051_v42 }
 0xfb4   :  { %v1869_v47 = vpop.permute.xlu0 %1868  ;;  %2059 = vrot.lane.b32.xlu1 %v2057_v46, %s4089_s7 }
 0xfb5   :  { %v1871_v48 = vmul.f32 %v1869_v47, %v1865_v44 }
 0xfb7   :  { %1873 = vrot.lane.b32.xlu0 %v1871_v48, %s4089_s7 }
0x1026   :  { %v2060_v50 = vpop.permute.xlu1 %2059 }
0x1027   :  { %v4591_v51 = vadd.f32 %v2060_v50, %v2052_v49 }
0x1029   :  { %3772 = vtanh.f32 %v4591_v51  ;;  %v1874_v53 = vpop.permute.xlu0 %1873 }
0x102a   :  { %v4595_v54 = vadd.f32 %v1874_v53, %v1866_v52 }
0x102c   :  { %3774 = vtanh.f32 %v4595_v54 }
0x1036   :  { %v3773_v55 = vpop.eup %3772 }
0x1037   :  { %2065 = vrot.lane.b32.xlu1 %v3773_v55, %s4088_s4 }
0x1039   :  { %v3775_v56 = vpop.eup %3774 }
0x103a   :  { %1879 = vrot.lane.b32.xlu0 %v3775_v56, %s4088_s4 }
0x10a9   :  { %v2066_v57 = vpop.permute.xlu1 %2065 }
0x10aa   :  { %v2068_v58 = vmul.f32 %v2066_v57, %v2051_v42 }
0x10ac   :  { %v1880_v59 = vpop.permute.xlu0 %1879  ;;  %2140 = vrot.lane.b32.xlu1 %v2068_v58, %s4089_s7 }
0x10ad   :  { %v1882_v60 = vmul.f32 %v1880_v59, %v1865_v44 }
0x10af   :  { %1884 = vrot.lane.b32.xlu0 %v1882_v60, %s4089_s7  ;;  %v4727_v60 = vld [vmem:[#allocation13 + $0x18] sm:$0xff] }
0x111e   :  { %v2141_v61 = vpop.permute.xlu1 %2140 }
0x111f   :  { %3570 = vmatmul.mubr.msk.f32.vlgmr.msra.gmra.mxu0 %vm162_vm1, %v2141_v61 }
0x1120   :  { %3584 = vmatpush3.msra.mxu0 %v4603_v62  ;;  %3591 = vmatprep.mubr.msk.f32.mxu0 %vm4087_vm0, %v4086_v0 }
0x1121   :  { %3585 = vmatprep.subr.mxu0 %v4086_v0  ;;  %v1885_v63 = vpop.permute.xlu0 %1884 }
0x1122   :  { %3586 = vmatpush3.msra.mxu0 %v4609_v5  ;;  %3537 = vmatmul.mubr.msk.f32.vlgmr.msra.gmra.mxu1 %vm162_vm1, %v1885_v63 }
0x1123   :  { %3551 = vmatpush3.msra.mxu1 %v4613_v7  ;;  %3587 = vmatprep.subr.mxu0 %v4086_v0 }
0x1124   :  { %3552 = vmatprep.subr.mxu1 %v4086_v0  ;;  %3588 = vmatpush3.msra.mxu0 %v4618_v9 }
0x1125   :  { %3553 = vmatpush3.msra.mxu1 %v4621_v13  ;;  %3589 = vmatprep.subr.mxu0 %v4086_v0 }
0x1126   :  { %3554 = vmatprep.subr.mxu1 %v4086_v0  ;;  %3590 = vmatpush3.msra.mxu0 %v4626_v19 }
0x1127   :  { %3555 = vmatpush3.msra.mxu1 %v4629_v21  ;;  %3592 = vmatmul.mubr.msk.f32.vlgmr.msra.gmra.mxu0 %vm162_vm1, %v2141_v61  ;;  %v4735_v61 = vld [vmem:[#allocation13 + $0x10] sm:$0xff] }
0x1128   :  { %3556 = vmatprep.subr.mxu1 %v4086_v0  ;;  %3558 = vmatprep.mubr.msk.f32.mxu1 %vm4087_vm0, %v4086_v0 }
0x1129   :  { %3557 = vmatpush3.msra.mxu1 %v4636_v8  ;;  %3605 = vmatprep.subr.mxu0 %v4086_v0 }
0x112a   :  { %3559 = vmatmul.mubr.msk.f32.vlgmr.msra.gmra.mxu1 %vm162_vm1, %v1885_v63  ;;  %3606 = vmatpush3.msra.mxu0 %v4641_v6  ;;  %v4745_v63 = vld [vmem:[#allocation13] sm:$0xff] }
0x112b   :  { %3607 = vmatprep.subr.mxu0 %v4086_v0  ;;  %3572 = vmatprep.subr.mxu1 %v4086_v0 }
0x112c   :  { %3608 = vmatpush3.msra.mxu0 %v4646_v11  ;;  %3573 = vmatpush3.msra.mxu1 %v4314_v16 }
0x112d   :  { %3609 = vmatprep.subr.mxu0 %v4086_v0  ;;  %3574 = vmatprep.subr.mxu1 %v4086_v0 }
0x112e   :  { %3610 = vmatpush3.msra.mxu0 %v4652_v10  ;;  %3575 = vmatpush3.msra.mxu1 %v4316_v17 }
0x112f   :  { %3611 = vmatprep.subr.mxu0 %v4086_v0  ;;  %3613 = vmatprep.mubr.msk.f32.mxu0 %vm4087_vm0, %v4086_v0 }
0x1130   :  { %3612 = vmatpush3.msra.mxu0 %v4659_v22  ;;  %3576 = vmatprep.subr.mxu1 %v4086_v0 }
0x1131   :  { %3627 = vmatprep.subr.mxu0 %v4086_v0  ;;  %3577 = vmatpush3.msra.mxu1 %v4320_v18 }
0x1132   :  { %3578 = vmatprep.subr.mxu1 %v4086_v0  ;;  %3580 = vmatprep.mubr.msk.f32.mxu1 %vm4087_vm0, %v4086_v0 }
0x1133   :  { %3579 = vmatpush3.msra.mxu1 %v4324_v20  ;;  %v4675_v20 = vld [vmem:[%s4888_s6] ss:$0 sm:$0xff] }
0x1134   :  { %3594 = vmatprep.subr.mxu1 %v4086_v0 }
0x11df   :  { %v2210_v16 = vpop.f32.mrf.mxu0 }
0x11e1   :  { %v3571_v17 = vpop.f32.mrf.mxu0 }
0x11e2   :  { %v4670_v12 = vpop.f32.mrf.mxu1 }
0x11e4   :  { %v3538_v2 = vpop.f32.mrf.mxu1 }
0x11e7   :  { %v2396_v4 = vpop.f32.mrf.mxu0 }
0x11e8   :  { %v2400_v26 = vadd.f32 %v2396_v4, %v2329_v3 }
0x11e9   :  { %v3593_v27 = vpop.f32.mrf.mxu0 }
0x11ea   :  { %v3148_v28 = vmul.f32 -1.442695, %v2400_v26  ;;  %v2135_v18 = vpop.f32.mrf.mxu1 }
0x11eb   :  { %v2211_v29 = vadd.f32 %v2210_v16, %v2135_v18 }
0x11ec   :  { %3776 = vpow2.f32 %v3148_v28  ;;  %v3560_v30 = vpop.f32.mrf.mxu1 }
0x11ed   :  { %v2214_v31 = vadd.f32 %v4675_v20, %v2211_v29 }
0x11ef   :  { %v3145_v32 = vmul.f32 -1.442695, %v2214_v31 }
0x11f1   :  { %3778 = vpow2.f32 %v3145_v32 }
0x11f2   :  { %3780 = vtanh.f32 %v2400_v26 }
0x11f9   :  { %v3777_v33 = vpop.eup %3776 }
0x11fa   :  { %v2405_v23 = vadd.f32 1.0, %v3777_v33 }
0x11fc   :  { %3782 = vrcp.f32 %v2405_v23 }
0x11fd   :  { %3784 = vtanh.f32 %v2214_v31 }
0x11fe   :  { %v3779_v24 = vpop.eup %3778 }
0x11ff   :  { %v2219_v34 = vadd.f32 1.0, %v3779_v24  ;;  %v3781_v35 = vpop.eup %3780 }
0x1201   :  { %3786 = vrcp.f32 %v2219_v34 }
0x1209   :  { %v3783_v37 = vpop.eup %3782 }
0x120a   :  { %v2408_v38 = vsel %vm4221_vm4, %v3781_v35, %v3783_v37  ;;  %v3785_v39 = vpop.eup %3784 }
0x120b   :  { %2411 = vrot.lane.b32.xlu1 %v2408_v38, %s4088_s4  ;;  %v2409_v46 = vmul.f32 %v2408_v38, %v4591_v51 }
0x120e   :  { %v3787_v40 = vpop.eup %3786 }
0x120f   :  { %v2222_v42 = vsel %vm4221_vm4, %v3785_v39, %v3787_v40 }
0x1210   :  { %2225 = vrot.lane.b32.xlu0 %v2222_v42, %s4088_s4  ;;  %v2223_v49 = vmul.f32 %v2222_v42, %v4595_v54 }
0x127d   :  { %v2412_v43 = vpop.permute.xlu1 %2411 }
0x127e   :  { %v2414_v41 = vmul.f32 %v2412_v43, %v2408_v38 }
0x1280   :  { %2416 = vrot.lane.b32.xlu1 %v2414_v41, %s4089_s7 }
0x1282   :  { %v2226_v44 = vpop.permute.xlu0 %2225 }
0x1283   :  { %v2228_v45 = vmul.f32 %v2226_v44, %v2222_v42 }
0x1285   :  { %2230 = vrot.lane.b32.xlu0 %v2228_v45, %s4089_s7 }
0x12f2   :  { %v2417_v47 = vpop.permute.xlu1 %2416 }
0x12f3   :  { %v4687_v48 = vadd.f32 %v2417_v47, %v2409_v46 }
0x12f5   :  { %3788 = vtanh.f32 %v4687_v48 }
0x12f7   :  { %v2231_v50 = vpop.permute.xlu0 %2230 }
0x12f8   :  { %v4691_v52 = vadd.f32 %v2231_v50, %v2223_v49 }
0x12fa   :  { %3790 = vtanh.f32 %v4691_v52 }
0x1302   :  { %v3789_v53 = vpop.eup %3788 }
0x1303   :  { %2422 = vrot.lane.b32.xlu1 %v3789_v53, %s4088_s4 }
0x1307   :  { %v3791_v55 = vpop.eup %3790 }
0x1308   :  { %2236 = vrot.lane.b32.xlu0 %v3791_v55, %s4088_s4 }
0x1375   :  { %v2423_v56 = vpop.permute.xlu1 %2422 }
0x1376   :  { %v2425_v51 = vmul.f32 %v2423_v56, %v2408_v38 }
0x1378   :  { %2497 = vrot.lane.b32.xlu1 %v2425_v51, %s4089_s7 }
0x137a   :  { %v2237_v57 = vpop.permute.xlu0 %2236 }
0x137b   :  { %v2239_v58 = vmul.f32 %v2237_v57, %v2222_v42 }
0x137d   :  { %2241 = vrot.lane.b32.xlu0 %v2239_v58, %s4089_s7 }
0x13ea   :  { %v2498_v54 = vpop.permute.xlu1 %2497 }
0x13eb   :  { %3614 = vmatmul.mubr.msk.f32.vlgmr.msra.gmra.mxu0 %vm162_vm1, %v2498_v54 }
0x13ec   :  { %3628 = vmatpush3.msra.mxu0 %v4603_v62  ;;  %3635 = vmatprep.mubr.msk.f32.mxu0 %vm4087_vm0, %v4086_v0  ;;  %v4741_v62 = vld [vmem:[#allocation13 + $0x8] sm:$0xff] }
0x13ed   :  { %3629 = vmatprep.subr.mxu0 %v4086_v0 }
0x13ee   :  { %3630 = vmatpush3.msra.mxu0 %v4609_v5 }
0x13ef   :  { %3631 = vmatprep.subr.mxu0 %v4086_v0  ;;  %v2242_v59 = vpop.permute.xlu0 %2241 }
0x13f0   :  { %3632 = vmatpush3.msra.mxu0 %v4618_v9  ;;  %3581 = vmatmul.mubr.msk.f32.vlgmr.msra.gmra.mxu1 %vm162_vm1, %v2242_v59 }
0x13f1   :  { %3595 = vmatpush3.msra.mxu1 %v4613_v7  ;;  %3633 = vmatprep.subr.mxu0 %v4086_v0 }
0x13f2   :  { %3596 = vmatprep.subr.mxu1 %v4086_v0  ;;  %3634 = vmatpush3.msra.mxu0 %v4626_v19 }
0x13f3   :  { %3597 = vmatpush3.msra.mxu1 %v4621_v13  ;;  %3636 = vmatmul.mubr.msk.f32.vlgmr.msra.gmra.mxu0 %vm162_vm1, %v2498_v54 }
0x13f4   :  { %3598 = vmatprep.subr.mxu1 %v4086_v0  ;;  %3602 = vmatprep.mubr.msk.f32.mxu1 %vm4087_vm0, %v4086_v0 }
0x13f5   :  { %3599 = vmatpush3.msra.mxu1 %v4629_v21  ;;  %3649 = vmatprep.subr.mxu0 %v4086_v0 }
0x13f6   :  { %3600 = vmatprep.subr.mxu1 %v4086_v0  ;;  %3650 = vmatpush3.msra.mxu0 %v4641_v6  ;;  %v2686_v6 = vld [vmem:[#allocation2 + $0x38] sm:$0xff] }
0x13f7   :  { %3601 = vmatpush3.msra.mxu1 %v4636_v8  ;;  %3651 = vmatprep.subr.mxu0 %v4086_v0 }
0x13f8   :  { %3603 = vmatmul.mubr.msk.f32.vlgmr.msra.gmra.mxu1 %vm162_vm1, %v2242_v59  ;;  %3652 = vmatpush3.msra.mxu0 %v4646_v11 }
0x13f9   :  { %3653 = vmatprep.subr.mxu0 %v4086_v0  ;;  %3616 = vmatprep.subr.mxu1 %v4086_v0 }
0x13fa   :  { %3654 = vmatpush3.msra.mxu0 %v4652_v10  ;;  %3617 = vmatpush3.msra.mxu1 %v4727_v60 }
0x13fb   :  { %3655 = vmatprep.subr.mxu0 %v4086_v0  ;;  %3657 = vmatprep.mubr.msk.f32.mxu0 %vm4087_vm0, %v4086_v0 }
0x13fc   :  { %3656 = vmatpush3.msra.mxu0 %v4659_v22  ;;  %3618 = vmatprep.subr.mxu1 %v4086_v0 }
0x13fd   :  { %3619 = vmatpush3.msra.mxu1 %v4735_v61  ;;  %3624 = vmatprep.mubr.msk.f32.mxu1 %vm4087_vm0, %v4086_v0 }
0x13fe   :  { %3620 = vmatprep.subr.mxu1 %v4086_v0 }
0x13ff   :  { %3621 = vmatpush3.msra.mxu1 %v4741_v62 }
0x1400   :  { %3622 = vmatprep.subr.mxu1 %v4086_v0 }
0x1401   :  { %3623 = vmatpush3.msra.mxu1 %v4745_v63 }
0x1402   :  { %3638 = vmatprep.subr.mxu1 %v4086_v0 }
0x14ab   :  { %v2567_v5 = vpop.f32.mrf.mxu0 }
0x14ad   :  { %v3615_v9 = vpop.f32.mrf.mxu0 }
0x14b0   :  { %v4749_v19 = vpop.f32.mrf.mxu1 }
0x14b2   :  { %v3582_v11 = vpop.f32.mrf.mxu1 }
0x14b3   :  { %v2753_v10 = vpop.f32.mrf.mxu0 }
0x14b4   :  { %v2757_v22 = vadd.f32 %v2753_v10, %v2686_v6  ;;  %v528_v10 = vadd.f32 %v4804_v15, %v4378_v36 }
0x14b5   :  { %v3637_v16 = vpop.f32.mrf.mxu0 }
0x14b6   :  { %v3154_v17 = vmul.f32 -1.442695, %v2757_v22 }
0x14b8   :  { %3792 = vpow2.f32 %v3154_v17  ;;  %v2492_v2 = vpop.f32.mrf.mxu1 }
0x14b9   :  { %v2568_v3 = vadd.f32 %v2567_v5, %v2492_v2 }
0x14ba   :  { %v3604_v4 = vpop.f32.mrf.mxu1 }
0x14bb   :  { %v2571_v26 = vadd.f32 %v4675_v20, %v2568_v3 }
0x14bd   :  { %v3151_v27 = vmul.f32 -1.442695, %v2571_v26 }
0x14bf   :  { %3794 = vpow2.f32 %v3151_v27 }
0x14c0   :  { %3796 = vtanh.f32 %v2757_v22  ;;  %v4810_v22 = vadd.f32 %v4804_v15, %v4445_v25  ;;  %v4817_v25 = vadd.f32 %v4804_v15, %v4512_v14  ;;  %v4832_v14 = vadd.f32 %v4804_v15, %v4749_v19 }
0x14c5   :  { %v3793_v28 = vpop.eup %3792 }
0x14c6   :  { %v2762_v18 = vadd.f32 1.0, %v3793_v28 }
0x14c8   :  { %3798 = vrcp.f32 %v2762_v18 }
0x14c9   :  { %3800 = vtanh.f32 %v2571_v26 }
0x14cc   :  { %v3795_v29 = vpop.eup %3794 }
0x14cd   :  { %v2576_v30 = vadd.f32 1.0, %v3795_v29  ;;  %v3797_v31 = vpop.eup %3796  ;;  %v4822_v29 = vadd.f32 %v4804_v15, %v4579_v1 }
0x14cf   :  { %3802 = vrcp.f32 %v2576_v30  ;;  %v4827_v30 = vadd.f32 %v4804_v15, %v4670_v12 }
0x14d5   :  { %v3799_v32 = vpop.eup %3798 }
0x14d6   :  { %v2765_v33 = vsel %vm4221_vm4, %v3797_v31, %v3799_v32  ;;  %v3801_v23 = vpop.eup %3800 }
0x14d7   :  { %2768 = vrot.lane.b32.xlu1 %v2765_v33, %s4088_s4  ;;  %v2766_v40 = vmul.f32 %v2765_v33, %v4687_v48 }
0x14dc   :  { %v3803_v24 = vpop.eup %3802 }
0x14dd   :  { %v2579_v34 = vsel %vm4221_vm4, %v3801_v23, %v3803_v24 }
0x14de   :  { %2582 = vrot.lane.b32.xlu0 %v2579_v34, %s4088_s4  ;;  %v2580_v41 = vmul.f32 %v2579_v34, %v4691_v52 }
0x1549   :  { %v2769_v35 = vpop.permute.xlu1 %2768 }
0x154a   :  { %v2771_v37 = vmul.f32 %v2769_v35, %v2765_v33 }
0x154c   :  { %2773 = vrot.lane.b32.xlu1 %v2771_v37, %s4089_s7 }
0x1550   :  { %v2583_v38 = vpop.permute.xlu0 %2582 }
0x1551   :  { %v2585_v39 = vmul.f32 %v2583_v38, %v2579_v34 }
0x1553   :  { %2587 = vrot.lane.b32.xlu0 %v2585_v39, %s4089_s7 }
0x15be   :  { %v2774_v42 = vpop.permute.xlu1 %2773 }
0x15bf   :  { %v4761_v43 = vadd.f32 %v2774_v42, %v2766_v40 }
0x15c1   :  { %3804 = vtanh.f32 %v4761_v43 }
0x15c5   :  { %v2588_v44 = vpop.permute.xlu0 %2587 }
0x15c6   :  { %v2590_v45 = vadd.f32 %v2588_v44, %v2580_v41 }
0x15c8   :  { %3806 = vtanh.f32 %v2590_v45 }
0x15ce   :  { %v3805_v46 = vpop.eup %3804 }
0x15cf   :  { %2779 = vrot.lane.b32.xlu1 %v3805_v46, %s4088_s4 }
0x15d5   :  { %v3807_v47 = vpop.eup %3806 }
0x15d6   :  { %2593 = vrot.lane.b32.xlu0 %v3807_v47, %s4088_s4 }
0x1641   :  { %v2780_v49 = vpop.permute.xlu1 %2779 }
0x1642   :  { %v2782_v50 = vmul.f32 %v2780_v49, %v2765_v33 }
0x1644   :  { %2854 = vrot.lane.b32.xlu1 %v2782_v50, %s4089_s7 }
0x1648   :  { %v2594_v48 = vpop.permute.xlu0 %2593 }
0x1649   :  { %v2596_v53 = vmul.f32 %v2594_v48, %v2579_v34 }
0x164b   :  { %2598 = vrot.lane.b32.xlu0 %v2596_v53, %s4089_s7 }
0x16b6   :  { %v2855_v55 = vpop.permute.xlu1 %2854 }
0x16b7   :  { %3043 = vst.msk [vmem:[#allocation15] sm:$0xff] %vm162_vm1, %v2855_v55  ;;  %3658 = vmatmul.mubr.msk.f32.vlgmr.msra.gmra.mxu0 %vm162_vm1, %v2855_v55 }
0x16bd   :  { %v2599_v52 = vpop.permute.xlu0 %2598 }
0x16be   :  { %3625 = vmatmul.mubr.msk.f32.vlgmr.msra.gmra.mxu1 %vm162_vm1, %v2599_v52 }
0x16bf   :  { %3639 = vmatpush3.msra.mxu1 %v4613_v7  ;;  %3646 = vmatprep.mubr.msk.f32.mxu1 %vm4087_vm0, %v4086_v0 }
0x16c0   :  { %3640 = vmatprep.subr.mxu1 %v4086_v0 }
0x16c1   :  { %3641 = vmatpush3.msra.mxu1 %v4621_v13 }
0x16c2   :  { %3642 = vmatprep.subr.mxu1 %v4086_v0 }
0x16c3   :  { %3643 = vmatpush3.msra.mxu1 %v4629_v21 }
0x16c4   :  { %3644 = vmatprep.subr.mxu1 %v4086_v0 }
0x16c5   :  { %3645 = vmatpush3.msra.mxu1 %v4636_v8 }
0x16c6   :  { %3647 = vmatmul.mubr.msk.f32.vlgmr.msra.gmra.mxu1 %vm162_vm1, %v2599_v52  ;;  %3660 = vmatprep.subr.mxu1 %v4086_v0 }
0x16c7   :  { %3661 = vmatpush3.msra.mxu1 %v4727_v60  ;;  %3668 = vmatprep.mubr.msk.f32.mxu1 %vm4087_vm0, %v4086_v0 }
0x16c8   :  { %3662 = vmatprep.subr.mxu1 %v4086_v0 }
0x16c9   :  { %3663 = vmatpush3.msra.mxu1 %v4735_v61 }
0x16ca   :  { %3664 = vmatprep.subr.mxu1 %v4086_v0 }
0x16cb   :  { %3665 = vmatpush3.msra.mxu1 %v4741_v62 }
0x16cc   :  { %3666 = vmatprep.subr.mxu1 %v4086_v0 }
0x16cd   :  { %3667 = vmatpush3.msra.mxu1 %v4745_v63 }
0x1777   :  { %v2924_v7 = vpop.f32.mrf.mxu0 }
0x1779   :  { %v3659_v13 = vpop.f32.mrf.mxu0 }
0x177e   :  { %v2668_v21 = vpop.f32.mrf.mxu1 }
0x177f   :  { %v4836_v31 = vadd.f32 %v4804_v15, %v2668_v21 }
0x1780   :  { %v3626_v8 = vpop.f32.mrf.mxu1 }
0x1786   :  { %v2849_v56 = vpop.f32.mrf.mxu1 }
0x1787   :  { %v2925_v51 = vadd.f32 %v2924_v7, %v2849_v56 }
0x1788   :  { %v3648_v57 = vpop.f32.mrf.mxu1 }
0x1789   :  { %v2928_v58 = vadd.f32 %v4675_v20, %v2925_v51 }
0x178b   :  { %v3157_v54 = vmul.f32 -1.442695, %v2928_v58 }
0x178d   :  { %3808 = vpow2.f32 %v3157_v54 }
0x178e   :  { %3810 = vtanh.f32 %v2928_v58 }
0x179a   :  { %v3809_v59 = vpop.eup %3808 }
0x179b   :  { %v2933_v60 = vadd.f32 1.0, %v3809_v59  ;;  %v3811_v61 = vpop.eup %3810 }
0x179d   :  { %3812 = vrcp.f32 %v2933_v60 }
0x17aa   :  { %v3813_v62 = vpop.eup %3812 }
0x17ab   :  { %v2936_v0 = vsel %vm4221_vm4, %v3811_v61, %v3813_v62 }
0x17ac   :  { %2939 = vrot.lane.b32.xlu0 %v2936_v0, %s4088_s4  ;;  %v2937_v9 = vmul.f32 %v2936_v0, %v2590_v45 }
0x181e   :  { %v2940_v63 = vpop.permute.xlu0 %2939 }
0x181f   :  { %v2942_v5 = vmul.f32 %v2940_v63, %v2936_v0 }
0x1821   :  { %2944 = vrot.lane.b32.xlu1 %v2942_v5, %s4089_s7 }
0x1893   :  { %v2945_v6 = vpop.permute.xlu1 %2944 }
0x1894   :  { %v4797_v20 = vadd.f32 %v2945_v6, %v2937_v9 }
0x1896   :  { %3814 = vtanh.f32 %v4797_v20 }
0x18a3   :  { %v3815_v11 = vpop.eup %3814 }
0x18a4   :  { %2950 = vrot.lane.b32.xlu0 %v3815_v11, %s4088_s4 }
0x18c3   :  { %531 = vmax.xlane.f32.xlu0 %v528_v10 }
0x18c7   :  { %887 = vmax.xlane.f32.xlu0 %v4810_v22 }
0x1916   :  { %v2951_v16 = vpop.permute.xlu0 %2950 }
0x1917   :  { %v2953_v17 = vmul.f32 %v2951_v16, %v2936_v0 }
0x1919   :  { %2955 = vrot.lane.b32.xlu1 %v2953_v17, %s4089_s7 }
0x194c   :  { %v532_v2 = vpop.xlane.xlu0 %531 }
0x194d   :  { %v533_v3 = vsub.f32 %v528_v10, %v532_v2 }
0x194f   :  { %v534_v4 = vmul.f32 1.442695, %v533_v3 }
0x1950   :  { %v888_v26 = vpop.xlane.xlu0 %887 }
0x1951   :  { %3816 = vpow2.f32 %v534_v4  ;;  %v889_v27 = vsub.f32 %v4810_v22, %v888_v26 }
0x1953   :  { %v890_v28 = vmul.f32 1.442695, %v889_v27 }
0x1955   :  { %3818 = vpow2.f32 %v890_v28 }
0x195e   :  { %v3817_v36 = vpop.eup %3816 }
0x195f   :  { %536 = vadd.xlane.f32.xlu1 %v3817_v36 }
0x1962   :  { %v3819_v18 = vpop.eup %3818 }
0x1963   :  { %1244 = vmax.xlane.f32.xlu1 %v4817_v25  ;;  %892 = vadd.xlane.f32.xlu0 %v3819_v18 }
0x1967   :  { %1601 = vmax.xlane.f32.xlu1 %v4822_v29 }
0x196b   :  { %1958 = vmax.xlane.f32.xlu1 %v4827_v30 }
0x196f   :  { %2315 = vmax.xlane.f32.xlu1 %v4832_v14 }
0x1973   :  { %2672 = vmax.xlane.f32.xlu1 %v4836_v31 }
0x198b   :  { %v2956_v1 = vpop.permute.xlu1 %2955 }
0x198c   :  { %3051 = vst.msk [vmem:[#allocation15 + $0x8] sm:$0xff] %vm162_vm1, %v2956_v1  ;;  %3669 = vmatmul.mubr.msk.f32.vlgmr.msra.gmra.mxu1 %vm162_vm1, %v2956_v1 }
0x19e8   :  { %v537_v12 = vpop.xlane.xlu1 %536 }
0x19e9   :  { %3820 = vlog2.f32 %v537_v12 }
0x19ec   :  { %v1245_v32 = vpop.xlane.xlu1 %1244  ;;  %v893_v33 = vpop.xlane.xlu0 %892 }
0x19ed   :  { %v1246_v23 = vsub.f32 %v4817_v25, %v1245_v32  ;;  %3822 = vlog2.f32 %v893_v33 }
0x19ef   :  { %v1247_v19 = vmul.f32 1.442695, %v1246_v23 }
0x19f0   :  { %v1602_v24 = vpop.xlane.xlu1 %1601 }
0x19f1   :  { %3824 = vpow2.f32 %v1247_v19  ;;  %v1603_v34 = vsub.f32 %v4822_v29, %v1602_v24 }
0x19f3   :  { %v1604_v35 = vmul.f32 1.442695, %v1603_v34 }
0x19f4   :  { %v1959_v37 = vpop.xlane.xlu1 %1958 }
0x19f5   :  { %3826 = vpow2.f32 %v1604_v35  ;;  %v1960_v38 = vsub.f32 %v4827_v30, %v1959_v37 }
0x19f6   :  { %v3821_v39 = vpop.eup %3820 }
0x19f7   :  { %v539_v40 = vmul.f32 0.6931472, %v3821_v39  ;;  %v1961_v42 = vmul.f32 1.442695, %v1960_v38 }
0x19f8   :  { %v2316_v41 = vpop.xlane.xlu1 %2315 }
0x19f9   :  { %v540_v44 = vadd.f32 %v539_v40, %v532_v2  ;;  %3828 = vpow2.f32 %v1961_v42  ;;  %v2317_v45 = vsub.f32 %v4832_v14, %v2316_v41 }
0x19fa   :  { %v3823_v46 = vpop.eup %3822 }
0x19fb   :  { %v541_v47 = vsub.f32 %v528_v10, %v540_v44  ;;  %v895_v49 = vmul.f32 0.6931472, %v3823_v46  ;;  %v2318_v50 = vmul.f32 1.442695, %v2317_v45 }
0x19fc   :  { %v2673_v48 = vpop.xlane.xlu1 %2672 }
0x19fd   :  { %542 = vst [vmem:[#allocation14] sm:$0xff] %v541_v47  ;;  %v896_v53 = vadd.f32 %v895_v49, %v888_v26  ;;  %3830 = vpow2.f32 %v2318_v50  ;;  %v2674_v55 = vsub.f32 %v4836_v31, %v2673_v48 }
0x19fe   :  { %v3825_v52 = vpop.eup %3824 }
0x19ff   :  { %v897_v7 = vsub.f32 %v4810_v22, %v896_v53  ;;  %v2675_v13 = vmul.f32 1.442695, %v2674_v55  ;;  %1249 = vadd.xlane.f32.xlu0 %v3825_v52 }
0x1a01   :  { %899 = vst [vmem:[#allocation14 + $0x8] sm:$0xff] %v897_v7  ;;  %3832 = vpow2.f32 %v2675_v13 }
0x1a02   :  { %v3827_v21 = vpop.eup %3826 }
0x1a03   :  { %1606 = vadd.xlane.f32.xlu0 %v3827_v21 }
0x1a06   :  { %v3829_v8 = vpop.eup %3828 }
0x1a07   :  { %1963 = vadd.xlane.f32.xlu0 %v3829_v8 }
0x1a0a   :  { %v3831_v56 = vpop.eup %3830 }
0x1a0b   :  { %2320 = vadd.xlane.f32.xlu0 %v3831_v56 }
0x1a0e   :  { %v3833_v51 = vpop.eup %3832 }
0x1a0f   :  { %2677 = vadd.xlane.f32.xlu0 %v3833_v51 }
0x1a4c   :  { %v3025_v57 = vpop.f32.mrf.mxu1 }
0x1a4d   :  { %v4848_v58 = vadd.f32 %v4804_v15, %v3025_v57 }
0x1a4e   :  { %v3670_v54 = vpop.f32.mrf.mxu1 }
0x1a4f   :  { %3029 = vmax.xlane.f32.xlu1 %v4848_v58 }
0x1a60   :  { %3045 = vrot.lane.b32.xlu1 %v4761_v43, %s4090_s8 }
0x1a88   :  { %v1250_v59 = vpop.xlane.xlu0 %1249 }
0x1a89   :  { %3834 = vlog2.f32 %v1250_v59 }
0x1a8c   :  { %v1607_v60 = vpop.xlane.xlu0 %1606 }
0x1a8d   :  { %3836 = vlog2.f32 %v1607_v60 }
0x1a90   :  { %v1964_v61 = vpop.xlane.xlu0 %1963 }
0x1a91   :  { %3838 = vlog2.f32 %v1964_v61 }
0x1a94   :  { %v2321_v62 = vpop.xlane.xlu0 %2320 }
0x1a95   :  { %3840 = vlog2.f32 %v2321_v62 }
0x1a96   :  { %v3835_v0 = vpop.eup %3834 }
0x1a97   :  { %v1252_v63 = vmul.f32 0.6931472, %v3835_v0 }
0x1a98   :  { %v2678_v5 = vpop.xlane.xlu0 %2677 }
0x1a99   :  { %v1253_v9 = vadd.f32 %v1252_v63, %v1245_v32  ;;  %3842 = vlog2.f32 %v2678_v5 }
0x1a9a   :  { %v3837_v6 = vpop.eup %3836 }
0x1a9b   :  { %v1254_v11 = vsub.f32 %v4817_v25, %v1253_v9  ;;  %v1609_v15 = vmul.f32 0.6931472, %v3837_v6 }
0x1a9d   :  { %1256 = vst [vmem:[#allocation14 + $0x10] sm:$0xff] %v1254_v11  ;;  %v1610_v10 = vadd.f32 %v1609_v15, %v1602_v24 }
0x1a9e   :  { %v3839_v43 = vpop.eup %3838 }
0x1a9f   :  { %v1611_v22 = vsub.f32 %v4822_v29, %v1610_v10  ;;  %v1966_v16 = vmul.f32 0.6931472, %v3839_v43 }
0x1aa1   :  { %1613 = vst [vmem:[#allocation14 + $0x18] sm:$0xff] %v1611_v22  ;;  %v1967_v17 = vadd.f32 %v1966_v16, %v1959_v37 }
0x1aa2   :  { %v3841_v2 = vpop.eup %3840 }
0x1aa3   :  { %v1968_v3 = vsub.f32 %v4827_v30, %v1967_v17  ;;  %v2323_v4 = vmul.f32 0.6931472, %v3841_v2 }
0x1aa5   :  { %1970 = vst [vmem:[#allocation14 + $0x20] sm:$0xff] %v1968_v3  ;;  %v2324_v26 = vadd.f32 %v2323_v4, %v2316_v41 }
0x1aa6   :  { %v3843_v27 = vpop.eup %3842 }
0x1aa7   :  { %v2325_v28 = vsub.f32 %v4832_v14, %v2324_v26  ;;  %v2680_v36 = vmul.f32 0.6931472, %v3843_v27 }
0x1aa9   :  { %2327 = vst [vmem:[#allocation14 + $0x28] sm:$0xff] %v2325_v28  ;;  %v2681_v25 = vadd.f32 %v2680_v36, %v2673_v48 }
0x1aab   :  { %v2682_v18 = vsub.f32 %v4836_v31, %v2681_v25 }
0x1aad   :  { %2684 = vst [vmem:[#allocation14 + $0x30] sm:$0xff] %v2682_v18 }
0x1ad8   :  { %v3030_v1 = vpop.xlane.xlu1 %3029 }
0x1ad9   :  { %v3031_v29 = vsub.f32 %v4848_v58, %v3030_v1 }
0x1adb   :  { %v3032_v12 = vmul.f32 1.442695, %v3031_v29 }
0x1adc   :  { %v3046_v32 = vpop.permute.xlu1 %3045 }
0x1add   :  { %3844 = vpow2.f32 %v3032_v12  ;;  %3048 = vst.msk [vmem:[#allocation17] sm:$0xff] %vm162_vm1, %v3046_v32 }
0x1aea   :  { %v3845_v30 = vpop.eup %3844 }
0x1aeb   :  { %3034 = vadd.xlane.f32.xlu0 %v3845_v30 }
0x1b01   :  { %3053 = vrot.lane.b32.xlu0 %v4797_v20, %s4090_s8 }
0x1b02   :  { %4016 = shalt.err (!%p4013_p11)
}
0x1b03   :  { %3081 = dma.vmem_to_hbm [thread:$0]  %s3076_s17, 256, %s4892_s10, [#allocation16], %s4079_s22, %s4079_s22, %s4080_s23  }
0x1b04   :  { %s4092_s21 = smov [#allocation17]  }
0x1b05   :  { %s3087_s5 = sshll.u32 %s4092_s21, 4  ;;  %s3088_s5 = int_to_ptr.vmem [resolvable:$true] %s3087_s5 }
0x1b06   :  { %s4025_s24 = scalar_lea.vmem %s3088_s5, 256  ;;  %p4030_p13 = scmp.lt.s32.totalorder %s3088_s5, %s3088_s5 }
0x1b07   :  { %p4026_p12 = scmp.ne.s32.totalorder %s3088_s5, %s4025_s24  ;;  %p4031_p0 = scmp.lt.s32.totalorder %s4025_s24, %s4025_s24 }
0x1b09   :  { %p4032_p1 = por %p4031_p0, %p4030_p13 }
0x1b0b   :  { %p4033_p2 = pnand %p4032_p1, %p4026_p12 }
0x1b74   :  { %v3035_v14 = vpop.xlane.xlu0 %3034 }
0x1b75   :  { %3846 = vlog2.f32 %v3035_v14 }
0x1b78   :  { %v3054_v20 = vpop.permute.xlu0 %3053 }
0x1b79   :  { %3057 = vst.msk [vmem:[#allocation17 + $0x8] sm:$0xff] %vm162_vm1, %v3054_v20 }
0x1b7a   :  { %4036 = shalt.err (!%p4033_p2)
}
0x1b7b   :  { %3093 = dma.vmem_to_hbm [thread:$0]  %s3088_s5, 256, %s4893_s11, [#allocation16], %s4079_s22, %s4079_s22, %s4080_s23  }
0x1b7c   :  { %s4093_s0 = smov [#allocation14]  }
0x1b7d   :  { %s3063_s26 = sshll.u32 %s4093_s0, 4  ;;  %s3064_s26 = int_to_ptr.vmem [resolvable:$true] %s3063_s26 }
0x1b7e   :  { %s4045_s27 = scalar_lea.vmem %s3064_s26, 1024  ;;  %p4050_p4 = scmp.lt.s32.totalorder %s3064_s26, %s3064_s26 }
0x1b7f   :  { %p4046_p3 = scmp.ne.s32.totalorder %s3064_s26, %s4045_s27  ;;  %p4051_p5 = scmp.lt.s32.totalorder %s4045_s27, %s4045_s27 }
0x1b81   :  { %p4052_p6 = por %p4051_p5, %p4050_p4 }
0x1b82   :  { %v3847_v31 = vpop.eup %3846 }
0x1b83   :  { %v3037_v33 = vmul.f32 0.6931472, %v3847_v31  ;;  %p4053_p7 = pnand %p4052_p6, %p4046_p3 }
0x1b85   :  { %v3038_v23 = vadd.f32 %v3037_v33, %v3030_v1 }
0x1b87   :  { %v3039_v19 = vsub.f32 %v4848_v58, %v3038_v23 }
0x1b89   :  { %3041 = vst [vmem:[#allocation14 + $0x38] sm:$0xff] %v3039_v19 }
0x1b8a   :  { %4056 = shalt.err (!%p4053_p7)
}
0x1b8b   :  { %3069 = dma.vmem_to_hbm [thread:$0]  %s3064_s26, 1024, %s4891_s9, [#allocation4], %s4079_s22, %s4079_s22, %s4080_s23  }
0x1b8c   :  { %4073 = dma.done.wait [#allocation4], 1024  }
0x1b8d   :  { %4074 = vsyncadd [#allocation4], 4294966272 }
0x1b8e   :  { %4075 = dma.done.wait [#allocation16], 512  }
0x1b8f   :  { %4076 = vsyncadd [#allocation16], 4294966784 }
0x1b90   :  { %3103 = vsyncpa [#allocation3], 1 }
0x1b91   :  { %3104 = vsyncpa [#allocation6], 1 }
0x1b92   :  { %3105 = vsyncpa [#allocation9], 1 }
0x1b93   :  { %3106 = vsyncpa [#allocation12], 1 }
0x1b94   :  { %3107 = vsyncpa [#allocation4], 1 }
0x1b95   :  { %3108 = vsyncpa [#allocation16], 1 }

</bundles_post_ra>
